<compile_context>
chip_gen: v7x
topology: tpu7x:2x2x1
jax: 0.10.0
libtpu: 0.0.40
codegen_flags: <defaults>
</compile_context>

<pallas_src>
import functools
import math

import jax
import jax.numpy as jnp
from jax import lax
from jax.experimental import pallas as pl
from jax.experimental.pallas import tpu as pltpu


def _cdiv(a: int, b: int) -> int:
    return (a + b - 1) // b


def _round_up(x: int, m: int) -> int:
    return ((x + m - 1) // m) * m


def _make_sinusoidal_pe(max_len: int, d_model: int) -> jnp.ndarray:
    """Standard wenet sinusoidal positional-encoding table (max_len, d_model)."""
    position = jnp.arange(max_len, dtype=jnp.float32)[:, None]
    div_term = jnp.exp(
        jnp.arange(0, d_model, 2, dtype=jnp.float32)
        * -(math.log(10000.0) / d_model))
    pe = jnp.zeros((max_len, d_model), dtype=jnp.float32)
    pe = pe.at[:, 0::2].set(jnp.sin(position * div_term))
    pe = pe.at[:, 1::2].set(jnp.cos(position * div_term))
    return pe


# --------------------------- fused forward kernel ---------------------------
def _fused_subsample4_kernel(p_ref, w1_ref, b1_ref, w2_ref, b2_ref, wo_ref,
                             bo_ref, pe_ref, o_ref, *,
                             n_even: int, n_f1: int, t_blk: int, tile_t: int,
                             n_f2: int, odim: int, xscale: float, cdt):
    # p_ref : (1, 1, n_f1*t_blk, 9)  conv1 9-tap patches for this (batch, time tile),
    #         rows = f1(phase-split even/odd) * t_blk + t1_local(phase-split even/odd)
    # w1_ref: (9, odim)              conv1 weight (tap-major rows)
    # w2_ref: (9*odim, odim)         conv2 weight, row = (kh*3+kw)*odim + c_in
    # wo_ref: (n_f2*odim, odim)      Linear weight as stacked per-frequency blocks
    # pe_ref: (tile_t, odim)         positional-encoding rows for this time tile
    # o_ref : (1, tile_t, odim)

    # ---- conv1 + ReLU (K = 9 matmul; h1 stays entirely in VMEM) ----
    h1 = jnp.dot(p_ref[0, 0], w1_ref[...], preferred_element_type=jnp.float32)
    h1 = jnp.maximum(h1 + b1_ref[...], 0.0).astype(cdt)
    h1 = h1.reshape(n_f1, t_blk, odim)      # (freq[even|odd], time[even|odd phases], c)

    # ---- conv2 im2col from VMEM-resident h1: unit-stride static slices only ----
    f_start = (0, n_even, 1)                # kw = 0 (even f), 1 (odd f), 2 (even f, +1)
    t_start = (0, tile_t + 8, 1)            # kh = 0 (even t), 1 (odd t), 2 (even t, +1)
    taps = []
    for kh in range(3):
        for kw in range(3):
            tap = h1[f_start[kw]:f_start[kw] + n_f2,
                     t_start[kh]:t_start[kh] + tile_t, :]
            taps.append(tap.reshape(n_f2 * tile_t, odim))
    patches = jnp.concatenate(taps, axis=1)             # (n_f2*tile_t, 9*odim)

    # ---- conv2 + ReLU as a single deep-K matmul (K = 9*odim) ----
    h2 = jnp.dot(patches, w2_ref[...], preferred_element_type=jnp.float32)
    h2 = jnp.maximum(h2 + b2_ref[...], 0.0).astype(cdt)  # (n_f2*tile_t, odim)

    # ---- Linear: lane-dense (tile_t, n_f2*odim) input, one deep-K matmul ----
    lin_in = jnp.concatenate(
        [h2[f * tile_t:(f + 1) * tile_t, :] for f in range(n_f2)], axis=1)
    y = jnp.dot(lin_in, wo_ref[...], preferred_element_type=jnp.float32) + bo_ref[...]

    # ---- positional encoding:  y*sqrt(odim) + pe ----
    o_ref[0] = (y * xscale + pe_ref[...]).astype(o_ref.dtype)


def conv2d_subsampling4_forward(x, x_mask, params, offset: int = 0, *,
                                time_tile: int = 64,
                                compute_dtype=jnp.bfloat16):
    """Pallas-backed Conv2dSubsampling4.forward (eval mode).

    Args:
      x:      (B, T, idim) float32
      x_mask: (B, 1, T)    bool
      params: dict with  w1 (odim,1,3,3), b1 (odim,), w2 (odim,odim,3,3), b2 (odim,),
              w_out (odim, odim*F2), b_out (odim,), pe (max_len, odim)
    Returns:
      (y, pos_emb, sub_mask) with y: (B, T2, odim), pos_emb: (1, T2, odim).
    """
    B, T, idim = x.shape
    w1 = params["w1"]
    w2 = params["w2"]
    w_out = params["w_out"]
    odim = w1.shape[0]
    assert odim % 128 == 0, "odim must be a multiple of 128 for lane-dense layout"

    T1 = (T - 1) // 2
    F1 = (idim - 1) // 2
    T2 = (T1 - 1) // 2
    F2 = (F1 - 1) // 2
    assert T2 >= 1 and F2 >= 1, "input too small for two stride-2 3x3 convs"
    n_even = (F1 + 1) // 2
    xscale = float(math.sqrt(odim))
    assert offset + T2 <= params["pe"].shape[0], "pe table too short for offset+T2"

    # ---- output-time tiling: last tile is never mostly padding ----
    n_t = max(1, _cdiv(T2, time_tile))
    tile_t = _round_up(_cdiv(T2, n_t), 8)
    n_t = _cdiv(T2, tile_t)
    t_blk = 2 * tile_t + 8            # phase-0 rows (tile_t + 8, incl. +1 halo) + phase-1 rows

    # ---- conv1 im2col (9 taps) over all (t1, f1); x is tiny so this gather stays in XLA.
    #      Frequency axis re-ordered phase-split (even f1 first, then odd) so conv2 taps are
    #      unit-stride slices in-kernel. ----
    taps1 = [x[:, kh:kh + 2 * T1 - 1:2, kw:kw + 2 * F1 - 1:2]
             for kh in range(3) for kw in range(3)]
    p_full = jnp.stack(taps1, axis=-1)                       # (B, T1, F1, 9)
    f_order = jnp.concatenate([jnp.arange(0, F1, 2), jnp.arange(1, F1, 2)])
    p_full = p_full[:, :, f_order, :]

    # ---- time phase-split + per-tile halo, baked into a small HBM tensor ----
    T1_need = 2 * (n_t * tile_t + 8)
    p_full = jnp.pad(p_full, ((0, 0), (0, T1_need - T1), (0, 0), (0, 0)))
    evens = p_full[:, 0::2]                                  # (B, n_t*tile_t+8, F1, 9)
    odds = p_full[:, 1::2]
    win = jnp.arange(n_t)[:, None] * tile_t + jnp.arange(tile_t + 8)[None, :]
    tiles_e = evens[:, win]                                  # (B, n_t, tile_t+8, F1, 9)
    tiles_o = odds[:, :n_t * tile_t].reshape(B, n_t, tile_t, F1, 9)
    p_tiles = jnp.concatenate([tiles_e, tiles_o], axis=2)    # (B, n_t, t_blk, F1, 9)
    p_tiles = jnp.transpose(p_tiles, (0, 1, 3, 2, 4)).reshape(B, n_t, F1 * t_blk, 9)
    p_tiles = p_tiles.astype(compute_dtype)

    # ---- weights: constant index maps -> DMA'd once, VMEM-resident for the whole grid ----
    w1p = jnp.transpose(w1.reshape(odim, 9)).astype(compute_dtype)        # (9, odim)
    b1 = params["b1"].reshape(1, odim).astype(jnp.float32)
    w2f = jnp.transpose(w2, (2, 3, 1, 0)).reshape(9 * odim, odim).astype(compute_dtype)
    b2 = params["b2"].reshape(1, odim).astype(jnp.float32)
    wo = jnp.transpose(w_out.reshape(odim, odim, F2), (2, 1, 0)).reshape(
        F2 * odim, odim).astype(compute_dtype)
    bo = params["b_out"].reshape(1, odim).astype(jnp.float32)

    pe_slice = lax.dynamic_slice(params["pe"], (offset, 0), (T2, odim))
    pe_pad = jnp.pad(pe_slice, ((0, n_t * tile_t - T2), (0, 0))).astype(jnp.float32)

    el = jnp.dtype(compute_dtype).itemsize
    cost = pl.CostEstimate(
        flops=2 * B * n_t * (F1 * t_blk * 9 * odim
                             + F2 * tile_t * 9 * odim * odim
                             + tile_t * F2 * odim * odim),
        transcendentals=0,
        bytes_accessed=(B * n_t * F1 * t_blk * 9 * el
                        + (9 * odim + 9 * odim * odim + F2 * odim * odim) * el
                        + 4 * (3 * odim + n_t * tile_t * odim
                               + B * n_t * tile_t * odim)))

    kernel = functools.partial(
        _fused_subsample4_kernel, n_even=n_even, n_f1=F1, t_blk=t_blk,
        tile_t=tile_t, n_f2=F2, odim=odim, xscale=xscale, cdt=compute_dtype)

    y_pad = pl.pallas_call(
        kernel,
        out_shape=jax.ShapeDtypeStruct((B, n_t * tile_t, odim), jnp.float32),
        grid_spec=pltpu.PrefetchScalarGridSpec(
            num_scalar_prefetch=0,
            # time OUTER, batch inner -> pe block index is constant across the inner axis.
            grid=(n_t, B),
            in_specs=[
                pl.BlockSpec((1, 1, F1 * t_blk, 9), lambda t, b: (b, t, 0, 0)),
                pl.BlockSpec((9, odim), lambda t, b: (0, 0)),
                pl.BlockSpec((1, odim), lambda t, b: (0, 0)),
                pl.BlockSpec((9 * odim, odim), lambda t, b: (0, 0)),
                pl.BlockSpec((1, odim), lambda t, b: (0, 0)),
                pl.BlockSpec((F2 * odim, odim), lambda t, b: (0, 0)),
                pl.BlockSpec((1, odim), lambda t, b: (0, 0)),
                pl.BlockSpec((tile_t, odim), lambda t, b: (t, 0)),
            ],
            out_specs=pl.BlockSpec((1, tile_t, odim), lambda t, b: (b, t, 0)),
        ),
        compiler_params=pltpu.CompilerParams(
            dimension_semantics=("parallel", "parallel"),
            # Explicit scoped-VMEM budget with headroom; fits v5e/v6e (128 MiB) and v7x (64 MiB).
            vmem_limit_bytes=48 * 1024 * 1024),
        cost_estimate=cost,
    )(p_tiles, w1p, b1, w2f, b2, wo, bo, pe_pad)

    y = y_pad[:, :T2, :]
    pos_emb = pe_slice[None, :, :]                  # (1, T2, odim)
    sub_mask = x_mask[:, :, :-2:2][:, :, :-2:2]     # 4x time subsampled mask
    return y, pos_emb, sub_mask


# ------------------------------- pure-JAX reference -------------------------------
def _reference_forward(x, x_mask, params, offset: int = 0):
    odim = params["w1"].shape[0]
    hp = lax.Precision.HIGHEST
    h = lax.conv_general_dilated(
        x[:, None, :, :], params["w1"], window_strides=(2, 2), padding="VALID",
        dimension_numbers=("NCHW", "OIHW", "NCHW"), precision=hp)
    h = jax.nn.relu(h + params["b1"][None, :, None, None])
    h = lax.conv_general_dilated(
        h, params["w2"], window_strides=(2, 2), padding="VALID",
        dimension_numbers=("NCHW", "OIHW", "NCHW"), precision=hp)
    h = jax.nn.relu(h + params["b2"][None, :, None, None])
    b, c, t, f = h.shape
    h = jnp.transpose(h, (0, 2, 1, 3)).reshape(b, t, c * f)
    y = jnp.dot(h, params["w_out"].T, precision=hp) + params["b_out"]
    pe = lax.dynamic_slice(params["pe"], (offset, 0), (t, odim))[None]
    y = y * math.sqrt(odim) + pe
    return y, pe, x_mask[:, :, :-2:2][:, :, :-2:2]


if __name__ == "__main__":
    B, T, idim, odim = 2, 32, 32, 128
    max_len = 256

    T1 = (T - 1) // 2
    F1 = (idim - 1) // 2
    T2 = (T1 - 1) // 2
    F2 = (F1 - 1) // 2

    key = jax.random.PRNGKey(0)
    k1, k2, k3, k4, k5, k6, kx = jax.random.split(key, 7)

    def _uniform(k, shape, fan_in):
        bound = 1.0 / math.sqrt(fan_in)
        return jax.random.uniform(k, shape, jnp.float32, -bound, bound)

    params = {
        "w1": _uniform(k1, (odim, 1, 3, 3), 9),
        "b1": _uniform(k2, (odim,), 9),
        "w2": _uniform(k3, (odim, odim, 3, 3), odim * 9),
        "b2": _uniform(k4, (odim,), odim * 9),
        "w_out": _uniform(k5, (odim, odim * F2), odim * F2),
        "b_out": _uniform(k6, (odim,), odim * F2),
        "pe": _make_sinusoidal_pe(max_len, odim),
    }

    x = jax.random.normal(kx, (B, T, idim), dtype=jnp.float32)
    x_mask = jnp.ones((B, 1, T), dtype=jnp.bool_)

    y_ref, pe_ref, mask_ref = _reference_forward(x, x_mask, params, offset=0)

    # f32 compute path: tight parity with the reference.
    fwd32 = jax.jit(functools.partial(conv2d_subsampling4_forward, offset=0,
                                      compute_dtype=jnp.float32))
    y32, pos_emb, sub_mask = jax.block_until_ready(fwd32(x, x_mask, params))

    assert y32.shape == (B, T2, odim), y32.shape
    assert pos_emb.shape == (1, T2, odim), pos_emb.shape
    assert sub_mask.shape == mask_ref.shape, (sub_mask.shape, mask_ref.shape)
    assert bool(jnp.all(sub_mask == mask_ref))
    assert jnp.allclose(pos_emb, pe_ref, atol=1e-6)
    err32 = float(jnp.max(jnp.abs(y32 - y_ref)))
    assert jnp.allclose(y32, y_ref, atol=2e-3, rtol=2e-3), err32

    # bf16 compute path (default, the performance configuration): loose sanity check.
    fwd16 = jax.jit(functools.partial(conv2d_subsampling4_forward, offset=0))
    y16, _, _ = jax.block_until_ready(fwd16(x, x_mask, params))
    err16 = float(jnp.max(jnp.abs(y16 - y_ref)))
    assert err16 < 0.25, err16

    print("KERNEL_OK")
</pallas_src>

<mosaic_0001>
module attributes {stable_mosaic.version = 11 : i64} {
  func.func @_fused_subsample4_kernel(%arg0: i32, %arg1: i32, %arg2: memref<1x1x360x9xf32, #tpu.memory_space<vmem>>, %arg3: memref<9x128xf32, #tpu.memory_space<vmem>>, %arg4: memref<1x128xf32, #tpu.memory_space<vmem>>, %arg5: memref<1152x128xf32, #tpu.memory_space<vmem>>, %arg6: memref<1x128xf32, #tpu.memory_space<vmem>>, %arg7: memref<896x128xf32, #tpu.memory_space<vmem>>, %arg8: memref<1x128xf32, #tpu.memory_space<vmem>>, %arg9: memref<8x128xf32, #tpu.memory_space<vmem>>, %arg10: memref<1x8x128xf32, #tpu.memory_space<vmem>>) attributes {dimension_semantics = [#tpu.dimension_semantics<parallel>, #tpu.dimension_semantics<parallel>], iteration_bounds = array<i64: 1, 2>, scalar_prefetch = 0 : i64, scratch_operands = 0 : i64, tpu.core_type = #tpu.core_type<tc>, window_params = [{transform_indices = @transform_0, window_bounds = array<i64: 1, 1, 360, 9>}, {pipeline_mode = #tpu.pipeline_mode<synchronous>, transform_indices = @transform_1, window_bounds = array<i64: 9, 128>}, {pipeline_mode = #tpu.pipeline_mode<synchronous>, transform_indices = @transform_2, window_bounds = array<i64: 1, 128>}, {pipeline_mode = #tpu.pipeline_mode<synchronous>, transform_indices = @transform_3, window_bounds = array<i64: 1152, 128>}, {pipeline_mode = #tpu.pipeline_mode<synchronous>, transform_indices = @transform_4, window_bounds = array<i64: 1, 128>}, {pipeline_mode = #tpu.pipeline_mode<synchronous>, transform_indices = @transform_5, window_bounds = array<i64: 896, 128>}, {pipeline_mode = #tpu.pipeline_mode<synchronous>, transform_indices = @transform_6, window_bounds = array<i64: 1, 128>}, {transform_indices = @transform_7, window_bounds = array<i64: 8, 128>}, {transform_indices = @transform_8, window_bounds = array<i64: 1, 8, 128>}]} {
    %c0 = arith.constant 0 : index
    %c0_0 = arith.constant 0 : index
    %c0_1 = arith.constant 0 : index
    %c0_2 = arith.constant 0 : index
    %0 = vector.load %arg2[%c0, %c0_0, %c0_1, %c0_2] : memref<1x1x360x9xf32, #tpu.memory_space<vmem>>, vector<1x1x360x9xf32>
    %1 = vector.shape_cast %0 : vector<1x1x360x9xf32> to vector<360x9xf32>
    %c0_3 = arith.constant 0 : index
    %c0_4 = arith.constant 0 : index
    %2 = vector.load %arg3[%c0_3, %c0_4] : memref<9x128xf32, #tpu.memory_space<vmem>>, vector<9x128xf32>
    %cst = arith.constant dense<0.000000e+00> : vector<360x128xf32>
    %3 = tpu.matmul %1, %2, %cst {dimension_numbers = #tpu.dot_dimension_numbers<[1], [0], [0], [1], [0, 0, 1, 1], [], []>} : vector<360x9xf32>, vector<9x128xf32>, vector<360x128xf32> -> vector<360x128xf32>
    %c0_5 = arith.constant 0 : index
    %c0_6 = arith.constant 0 : index
    %4 = vector.load %arg4[%c0_5, %c0_6] : memref<1x128xf32, #tpu.memory_space<vmem>>, vector<1x128xf32>
    %5 = vector.broadcast %4 : vector<1x128xf32> to vector<360x128xf32>
    %6 = arith.addf %3, %5 : vector<360x128xf32>
    %cst_7 = arith.constant 0.000000e+00 : f32
    %7 = vector.broadcast %cst_7 : f32 to vector<360x128xf32>
    %8 = arith.maximumf %6, %7 : vector<360x128xf32>
    %9 = vector.shape_cast %8 : vector<360x128xf32> to vector<15x24x128xf32>
    %10 = vector.extract_strided_slice %9 {offsets = [0, 0, 0], sizes = [7, 8, 128], strides = [1, 1, 1]} : vector<15x24x128xf32> to vector<7x8x128xf32>
    %11 = vector.shape_cast %10 : vector<7x8x128xf32> to vector<56x128xf32>
    %12 = vector.extract_strided_slice %9 {offsets = [8, 0, 0], sizes = [7, 8, 128], strides = [1, 1, 1]} : vector<15x24x128xf32> to vector<7x8x128xf32>
    %13 = vector.shape_cast %12 : vector<7x8x128xf32> to vector<56x128xf32>
    %14 = vector.extract_strided_slice %9 {offsets = [1, 0, 0], sizes = [7, 8, 128], strides = [1, 1, 1]} : vector<15x24x128xf32> to vector<7x8x128xf32>
    %15 = vector.shape_cast %14 : vector<7x8x128xf32> to vector<56x128xf32>
    %16 = vector.extract_strided_slice %9 {offsets = [0, 16, 0], sizes = [7, 8, 128], strides = [1, 1, 1]} : vector<15x24x128xf32> to vector<7x8x128xf32>
    %17 = vector.shape_cast %16 : vector<7x8x128xf32> to vector<56x128xf32>
    %18 = vector.extract_strided_slice %9 {offsets = [8, 16, 0], sizes = [7, 8, 128], strides = [1, 1, 1]} : vector<15x24x128xf32> to vector<7x8x128xf32>
    %19 = vector.shape_cast %18 : vector<7x8x128xf32> to vector<56x128xf32>
    %20 = vector.extract_strided_slice %9 {offsets = [1, 16, 0], sizes = [7, 8, 128], strides = [1, 1, 1]} : vector<15x24x128xf32> to vector<7x8x128xf32>
    %21 = vector.shape_cast %20 : vector<7x8x128xf32> to vector<56x128xf32>
    %22 = vector.extract_strided_slice %9 {offsets = [0, 1, 0], sizes = [7, 8, 128], strides = [1, 1, 1]} : vector<15x24x128xf32> to vector<7x8x128xf32>
    %23 = vector.shape_cast %22 : vector<7x8x128xf32> to vector<56x128xf32>
    %24 = vector.extract_strided_slice %9 {offsets = [8, 1, 0], sizes = [7, 8, 128], strides = [1, 1, 1]} : vector<15x24x128xf32> to vector<7x8x128xf32>
    %25 = vector.shape_cast %24 : vector<7x8x128xf32> to vector<56x128xf32>
    %26 = vector.extract_strided_slice %9 {offsets = [1, 1, 0], sizes = [7, 8, 128], strides = [1, 1, 1]} : vector<15x24x128xf32> to vector<7x8x128xf32>
    %27 = vector.shape_cast %26 : vector<7x8x128xf32> to vector<56x128xf32>
    %28 = tpu.concatenate %11, %13, %15, %17, %19, %21, %23, %25, %27 in 1 : vector<56x128xf32>, vector<56x128xf32>, vector<56x128xf32>, vector<56x128xf32>, vector<56x128xf32>, vector<56x128xf32>, vector<56x128xf32>, vector<56x128xf32>, vector<56x128xf32> -> vector<56x1152xf32>
    %c0_8 = arith.constant 0 : index
    %c0_9 = arith.constant 0 : index
    %29 = vector.load %arg5[%c0_8, %c0_9] : memref<1152x128xf32, #tpu.memory_space<vmem>>, vector<1152x128xf32>
    %cst_10 = arith.constant dense<0.000000e+00> : vector<56x128xf32>
    %30 = tpu.matmul %28, %29, %cst_10 {dimension_numbers = #tpu.dot_dimension_numbers<[1], [0], [0], [1], [0, 0, 1, 1], [], []>} : vector<56x1152xf32>, vector<1152x128xf32>, vector<56x128xf32> -> vector<56x128xf32>
    %c0_11 = arith.constant 0 : index
    %c0_12 = arith.constant 0 : index
    %31 = vector.load %arg6[%c0_11, %c0_12] : memref<1x128xf32, #tpu.memory_space<vmem>>, vector<1x128xf32>
    %32 = vector.broadcast %31 : vector<1x128xf32> to vector<56x128xf32>
    %33 = arith.addf %30, %32 : vector<56x128xf32>
    %cst_13 = arith.constant 0.000000e+00 : f32
    %34 = vector.broadcast %cst_13 : f32 to vector<56x128xf32>
    %35 = arith.maximumf %33, %34 : vector<56x128xf32>
    %36 = vector.extract_strided_slice %35 {offsets = [0, 0], sizes = [8, 128], strides = [1, 1]} : vector<56x128xf32> to vector<8x128xf32>
    %37 = vector.extract_strided_slice %35 {offsets = [8, 0], sizes = [8, 128], strides = [1, 1]} : vector<56x128xf32> to vector<8x128xf32>
    %38 = vector.extract_strided_slice %35 {offsets = [16, 0], sizes = [8, 128], strides = [1, 1]} : vector<56x128xf32> to vector<8x128xf32>
    %39 = vector.extract_strided_slice %35 {offsets = [24, 0], sizes = [8, 128], strides = [1, 1]} : vector<56x128xf32> to vector<8x128xf32>
    %40 = vector.extract_strided_slice %35 {offsets = [32, 0], sizes = [8, 128], strides = [1, 1]} : vector<56x128xf32> to vector<8x128xf32>
    %41 = vector.extract_strided_slice %35 {offsets = [40, 0], sizes = [8, 128], strides = [1, 1]} : vector<56x128xf32> to vector<8x128xf32>
    %42 = vector.extract_strided_slice %35 {offsets = [48, 0], sizes = [8, 128], strides = [1, 1]} : vector<56x128xf32> to vector<8x128xf32>
    %43 = tpu.concatenate %36, %37, %38, %39, %40, %41, %42 in 1 : vector<8x128xf32>, vector<8x128xf32>, vector<8x128xf32>, vector<8x128xf32>, vector<8x128xf32>, vector<8x128xf32>, vector<8x128xf32> -> vector<8x896xf32>
    %c0_14 = arith.constant 0 : index
    %c0_15 = arith.constant 0 : index
    %44 = vector.load %arg7[%c0_14, %c0_15] : memref<896x128xf32, #tpu.memory_space<vmem>>, vector<896x128xf32>
    %cst_16 = arith.constant dense<0.000000e+00> : vector<8x128xf32>
    %45 = tpu.matmul %43, %44, %cst_16 {dimension_numbers = #tpu.dot_dimension_numbers<[1], [0], [0], [1], [0, 0, 1, 1], [], []>} : vector<8x896xf32>, vector<896x128xf32>, vector<8x128xf32> -> vector<8x128xf32>
    %c0_17 = arith.constant 0 : index
    %c0_18 = arith.constant 0 : index
    %46 = vector.load %arg8[%c0_17, %c0_18] : memref<1x128xf32, #tpu.memory_space<vmem>>, vector<1x128xf32>
    %47 = vector.broadcast %46 : vector<1x128xf32> to vector<8x128xf32>
    %48 = arith.addf %45, %47 : vector<8x128xf32>
    %cst_19 = arith.constant 11.3137083 : f32
    %49 = vector.broadcast %cst_19 : f32 to vector<8x128xf32>
    %50 = arith.mulf %48, %49 : vector<8x128xf32>
    %c0_20 = arith.constant 0 : index
    %c0_21 = arith.constant 0 : index
    %51 = vector.load %arg9[%c0_20, %c0_21] : memref<8x128xf32, #tpu.memory_space<vmem>>, vector<8x128xf32>
    %52 = arith.addf %50, %51 : vector<8x128xf32>
    %c0_22 = arith.constant 0 : index
    %c0_23 = arith.constant 0 : index
    %c0_24 = arith.constant 0 : index
    %53 = vector.load %arg10[%c0_22, %c0_23, %c0_24] : memref<1x8x128xf32, #tpu.memory_space<vmem>>, vector<1x8x128xf32>
    %54 = vector.shape_cast %53 : vector<1x8x128xf32> to vector<8x128xf32>
    %55 = vector.shape_cast %52 : vector<8x128xf32> to vector<1x8x128xf32>
    tpu.vector_store %arg10[%c0_22, %c0_23, %c0_24], %55 {strides = array<i32>} : memref<1x8x128xf32, #tpu.memory_space<vmem>>, vector<1x8x128xf32>,
    return
  }
  func.func @transform_0(%arg0: i32, %arg1: i32) -> (i32, i32, i32, i32) {
    %c0_i32 = arith.constant 0 : i32
    %c0_i32_0 = arith.constant 0 : i32
    %c0_i32_1 = arith.constant 0 : i32
    return %arg1, %arg0, %c0_i32, %c0_i32_0 : i32, i32, i32, i32
  }
  func.func @transform_1(%arg0: i32, %arg1: i32) -> (i32, i32) {
    %c0_i32 = arith.constant 0 : i32
    %c0_i32_0 = arith.constant 0 : i32
    %c0_i32_1 = arith.constant 0 : i32
    return %c0_i32, %c0_i32_0 : i32, i32
  }
  func.func @transform_2(%arg0: i32, %arg1: i32) -> (i32, i32) {
    %c0_i32 = arith.constant 0 : i32
    %c0_i32_0 = arith.constant 0 : i32
    %c0_i32_1 = arith.constant 0 : i32
    return %c0_i32, %c0_i32_0 : i32, i32
  }
  func.func @transform_3(%arg0: i32, %arg1: i32) -> (i32, i32) {
    %c0_i32 = arith.constant 0 : i32
    %c0_i32_0 = arith.constant 0 : i32
    %c0_i32_1 = arith.constant 0 : i32
    return %c0_i32, %c0_i32_0 : i32, i32
  }
  func.func @transform_4(%arg0: i32, %arg1: i32) -> (i32, i32) {
    %c0_i32 = arith.constant 0 : i32
    %c0_i32_0 = arith.constant 0 : i32
    %c0_i32_1 = arith.constant 0 : i32
    return %c0_i32, %c0_i32_0 : i32, i32
  }
  func.func @transform_5(%arg0: i32, %arg1: i32) -> (i32, i32) {
    %c0_i32 = arith.constant 0 : i32
    %c0_i32_0 = arith.constant 0 : i32
    %c0_i32_1 = arith.constant 0 : i32
    return %c0_i32, %c0_i32_0 : i32, i32
  }
  func.func @transform_6(%arg0: i32, %arg1: i32) -> (i32, i32) {
    %c0_i32 = arith.constant 0 : i32
    %c0_i32_0 = arith.constant 0 : i32
    %c0_i32_1 = arith.constant 0 : i32
    return %c0_i32, %c0_i32_0 : i32, i32
  }
  func.func @transform_7(%arg0: i32, %arg1: i32) -> (i32, i32) {
    %c0_i32 = arith.constant 0 : i32
    %c0_i32_0 = arith.constant 0 : i32
    return %arg0, %c0_i32 : i32, i32
  }
  func.func @transform_8(%arg0: i32, %arg1: i32) -> (i32, i32, i32) {
    %c0_i32 = arith.constant 0 : i32
    %c0_i32_0 = arith.constant 0 : i32
    return %arg1, %arg0, %c0_i32 : i32, i32, i32
  }
}

</mosaic_0001>

<bundles_post_ra>
// kernel: conv2d_subsampling4_forward.1
= control target key start
LH: loop header
LB: loop body
LE: loop exit
PB: predicated region body
PF: predicated region fallthrough
CT: control target
= control target key end

     0   :  { %s3200_s27 = smov 0   ;;  %s3202_s28 = smov 0   ;;  %s4522_s0 = inlined_call_operand.vmem [shape: f32[2,1,360,9], index: 0, kind: input, shape index: {}]   ;;  %s4523_s1 = inlined_call_operand.vmem [shape: f32[9,128], index: 1, kind: input, shape index: {}]   ;;  %s4524_s2 = inlined_call_operand.vmem [shape: f32[1,128], index: 2, kind: input, shape index: {}]   ;;  %s4525_s3 = inlined_call_operand.vmem [shape: f32[1152,128], index: 3, kind: input, shape index: {}]   ;;  %s4526_s4 = inlined_call_operand.vmem [shape: f32[1,128], index: 4, kind: input, shape index: {}]   ;;  %s4527_s5 = inlined_call_operand.vmem [shape: f32[896,128], index: 5, kind: input, shape index: {}]   ;;  %s4528_s6 = inlined_call_operand.vmem [shape: f32[1,128], index: 6, kind: input, shape index: {}]   ;;  %s4529_s7 = inlined_call_operand.vmem [shape: f32[8,128], index: 7, kind: input, shape index: {}]   ;;  %s4530_s8 = inlined_call_operand.vmem [shape: f32[2,8,128], index: 8, kind: output, shape index: {}]  }
   0x1   :  { %s3204_s29 = smov 0  }
   0x2 LB: > { %s27_s30 = sadd.s32 1, %s3145_s28  ;;  %p2137_p0 = scmp.ge.s32.totalorder %s3149_s29, 1  ;;  %s3149_s29 = sphi %s3204_s29, %s18_s29   ;;  %s3145_s28 = sphi %s3202_s28, %s4532_s28   ;;  %s3141_s27 = sphi %s3200_s27, %s4531_s27  }
   0x3   : > { %p28_p1 = scmp.ge.s32.totalorder %s27_s30, 2  ;;  %p291_p2 = scmp.lt.s32.totalorder %s3149_s29, 3 }
   0x5   : > { %s4534_s30 = smov (%p28_p1, %s27_s30), 0  ;;  %p292_p3 = pnand %p2137_p0, %p291_p2 }
   0x6   : > { %v400_v0 = vld [vmem:[%s4523_s1] sm:$0xff] (!%p292_p3)  ;;  %v401_v1 = vld [vmem:[%s4523_s1 + $0x8] sm:$0x1] (!%p292_p3)  ;;  %vm545_vm0 = vcmask (!%p292_p3), 1040384   ;;  %v3151_v2 = vmov (!%p292_p3), 0.0|0.0   ;;  %vm3152_vm1 = vmmov (!%p292_p3), 1  }
   0x7   : > { %295 = sbr.rel (%p292_p3) target bundleno = 984 (0x3d8), region = 52  ;;  %2822 = vmatprep.subr.bf16.mxu0 (!%p292_p3), %v3151_v2  ;;  %v2823_v3 = vpack.c.bf16 (!%p292_p3), %v401_v1, %v400_v0  ;;  %vm2824_vm2 = vmpackc.low (!%p292_p3), %vm545_vm0, %vm3152_vm1  ;;  %p335_p4 = scmp.lt.s32.totalorder (!%p292_p3), %s3141_s27, 1  ;;  %vm3153_vm3 = vmmov (!%p292_p3), 0   ;;  %v3154_v4 = vmov (!%p292_p3), 0.0   ;;  %vm409_vm4 = vcmask (!%p292_p3), 72704   ;;  %v991_v44 = vld [vmem:[%s4525_s3 + $0x80] sm:$0xff] (!%p292_p3) }
   0x8   : > { %2599 = vmatprep.mubr.msk.f32.mxu0 (!%p292_p3), %vm3153_vm3, %v3154_v4  ;;  %v992_v45 = vld [vmem:[%s4525_s3 + $0x88] sm:$0xff] (!%p292_p3)  ;;  %v975_v47 = vld [vmem:[%s4525_s3] sm:$0xff] (!%p292_p3)  ;;  %v993_v51 = vld [vmem:[%s4525_s3 + $0x90] sm:$0xff] (!%p292_p3)  ;;  %vm898_vm5 = vcmask (!%p292_p3), 1046528  }
   0x9   : > { %2825 = vmatpush3.bf16.msk.msra.mxu0 (!%p292_p3), %vm2824_vm2, %v2823_v3  ;;  %v2826_v46 = vpack.c.bf16 (!%p292_p3), %v992_v45, %v991_v44  ;;  %v976_v48 = vld [vmem:[%s4525_s3 + $0x8] sm:$0xff] (!%p292_p3)  ;;  %v994_v52 = vld [vmem:[%s4525_s3 + $0x98] sm:$0xff] (!%p292_p3)  ;;  %v977_v54 = vld [vmem:[%s4525_s3 + $0x10] sm:$0xff] (!%p292_p3) }
   0xa   : > { %v2828_v49 = vpack.c.bf16 (!%p292_p3), %v976_v48, %v975_v47  ;;  %v2830_v53 = vpack.c.bf16 (!%p292_p3), %v994_v52, %v993_v51  ;;  %v978_v55 = vld [vmem:[%s4525_s3 + $0x18] sm:$0xff] (!%p292_p3)  ;;  %v995_v58 = vld [vmem:[%s4525_s3 + $0xa0] sm:$0xff] (!%p292_p3)  ;;  %v996_v59 = vld [vmem:[%s4525_s3 + $0xa8] sm:$0xff] (!%p292_p3) }
   0xb   : > { %2827 = vmatprep.subr.bf16.mxu1 (!%p292_p3), %v2826_v46  ;;  %v2832_v56 = vpack.c.bf16 (!%p292_p3), %v978_v55, %v977_v54  ;;  %v2834_v60 = vpack.c.bf16 (!%p292_p3), %v996_v59, %v995_v58  ;;  %v979_v61 = vld [vmem:[%s4525_s3 + $0x20] sm:$0xff] (!%p292_p3)  ;;  %v980_v62 = vld [vmem:[%s4525_s3 + $0x28] sm:$0xff] (!%p292_p3)  ;;  %v997_v1 = vld [vmem:[%s4525_s3 + $0xb0] sm:$0xff] (!%p292_p3) }
   0xc   : > { %2829 = vmatpush3.bf16.msra.mxu1 (!%p292_p3), %v2828_v49  ;;  %v2836_v63 = vpack.c.bf16 (!%p292_p3), %v980_v62, %v979_v61  ;;  %v998_v3 = vld [vmem:[%s4525_s3 + $0xb8] sm:$0xff] (!%p292_p3)  ;;  %v1023_v44 = vld [vmem:[%s4525_s3 + $0x180] sm:$0xff] (!%p292_p3)  ;;  %v1024_v45 = vld [vmem:[%s4525_s3 + $0x188] sm:$0xff] (!%p292_p3) }
   0xd   : > { %2831 = vmatprep.subr.bf16.mxu1 (!%p292_p3), %v2830_v53  ;;  %v2858_v46 = vpack.c.bf16 (!%p292_p3), %v1024_v45, %v1023_v44 }
   0xe   : > { %s4536_s27 = smov (!%p335_p4, %s3141_s27), 1 }
   0xf   : > { %s3098_s13 = smul.u32 360, %s4536_s27  ;;  %s2139_s15 = sshll.u32 %s4536_s27, 3 }
  0x10   : > { %2833 = vmatpush3.bf16.msra.mxu1 %v2832_v56  ;;  %s354_s21 = scalar_lea.vmem %s4530_s8, %s2139_s15 }
  0x11   : > { %s3233_s16 = scalar_lea.vmem %s4522_s0, %s3098_s13  ;;  %2835 = vmatprep.subr.bf16.mxu1 %v2834_v60 }
  0x12   : > { %v355_v5 = vld [vmem:[%s3233_s16] sm:$0xff]  ;;  %v356_v6 = vld [vmem:[%s3233_s16 + $0x8] sm:$0xff]  ;;  %v357_v7 = vld [vmem:[%s3233_s16 + $0x10] sm:$0xff] }
  0x13   : > { %2600 = vmatmul.mubr.msk.f32.vlgmr.msra.gmra.mrb[0].mxu0 %vm409_vm4, %v355_v5  ;;  %v358_v8 = vld [vmem:[%s3233_s16 + $0x18] sm:$0xff]  ;;  %v359_v9 = vld [vmem:[%s3233_s16 + $0x20] sm:$0xff]  ;;  %v360_v10 = vld [vmem:[%s3233_s16 + $0x28] sm:$0xff]  ;;  %v2838_v5 = vpack.c.bf16 %v998_v3, %v997_v1 }
  0x14   : > { %2602 = vmatprep.mubr.msk.f32.mxu0 %vm3153_vm3, %v3154_v4  ;;  %v361_v11 = vld [vmem:[%s3233_s16 + $0x30] sm:$0xff]  ;;  %v362_v12 = vld [vmem:[%s3233_s16 + $0x38] sm:$0xff]  ;;  %v363_v13 = vld [vmem:[%s3233_s16 + $0x40] sm:$0xff]  ;;  %2837 = vmatpush3.bf16.msra.mxu1 %v2836_v63 }
  0x15   : > { %v364_v14 = vld [vmem:[%s3233_s16 + $0x48] sm:$0xff]  ;;  %v365_v15 = vld [vmem:[%s3233_s16 + $0x50] sm:$0xff]  ;;  %v366_v16 = vld [vmem:[%s3233_s16 + $0x58] sm:$0xff]  ;;  %2839 = vmatprep.subr.bf16.mxu1 %v2838_v5 }
  0x16   : > { %v367_v17 = vld [vmem:[%s3233_s16 + $0x60] sm:$0xff]  ;;  %v368_v18 = vld [vmem:[%s3233_s16 + $0x68] sm:$0xff]  ;;  %v369_v19 = vld [vmem:[%s3233_s16 + $0x70] sm:$0xff] }
  0x17   : > { %2603 = vmatmul.mubr.msk.f32.gmra.mrb[2].mxu0 %vm409_vm4, %v356_v6  ;;  %v370_v20 = vld [vmem:[%s3233_s16 + $0x78] sm:$0xff]  ;;  %v371_v21 = vld [vmem:[%s3233_s16 + $0x80] sm:$0xff]  ;;  %v372_v22 = vld [vmem:[%s3233_s16 + $0x88] sm:$0xff] }
  0x18   : > { %2605 = vmatprep.mubr.msk.f32.mxu0 %vm3153_vm3, %v3154_v4  ;;  %v373_v23 = vld [vmem:[%s3233_s16 + $0x90] sm:$0xff]  ;;  %v374_v24 = vld [vmem:[%s3233_s16 + $0x98] sm:$0xff]  ;;  %v375_v25 = vld [vmem:[%s3233_s16 + $0xa0] sm:$0xff] }
  0x19   : > { %v376_v26 = vld [vmem:[%s3233_s16 + $0xa8] sm:$0xff]  ;;  %v377_v27 = vld [vmem:[%s3233_s16 + $0xb0] sm:$0xff]  ;;  %v378_v28 = vld [vmem:[%s3233_s16 + $0xb8] sm:$0xff] }
  0x1a   : > { %v379_v29 = vld [vmem:[%s3233_s16 + $0xc0] sm:$0xff]  ;;  %v380_v30 = vld [vmem:[%s3233_s16 + $0xc8] sm:$0xff]  ;;  %v381_v31 = vld [vmem:[%s3233_s16 + $0xd0] sm:$0xff] }
  0x1b   : > { %2606 = vmatmul.mubr.msk.f32.gmra.mrb[4].mxu0 %vm409_vm4, %v357_v7  ;;  %v382_v32 = vld [vmem:[%s3233_s16 + $0xd8] sm:$0xff]  ;;  %v383_v33 = vld [vmem:[%s3233_s16 + $0xe0] sm:$0xff]  ;;  %v384_v34 = vld [vmem:[%s3233_s16 + $0xe8] sm:$0xff] }
  0x1c   : > { %2608 = vmatprep.mubr.msk.f32.mxu0 %vm3153_vm3, %v3154_v4  ;;  %v385_v35 = vld [vmem:[%s3233_s16 + $0xf0] sm:$0xff]  ;;  %v386_v36 = vld [vmem:[%s3233_s16 + $0xf8] sm:$0xff]  ;;  %v387_v37 = vld [vmem:[%s3233_s16 + $0x100] sm:$0xff] }
  0x1d   : > { %v388_v38 = vld [vmem:[%s3233_s16 + $0x108] sm:$0xff]  ;;  %v389_v39 = vld [vmem:[%s3233_s16 + $0x110] sm:$0xff]  ;;  %v390_v40 = vld [vmem:[%s3233_s16 + $0x118] sm:$0xff] }
  0x1e   : > { %v391_v41 = vld [vmem:[%s3233_s16 + $0x120] sm:$0xff]  ;;  %v392_v42 = vld [vmem:[%s3233_s16 + $0x128] sm:$0xff]  ;;  %v393_v43 = vld [vmem:[%s3233_s16 + $0x130] sm:$0xff] }
  0x1f   : > { %2609 = vmatmul.mubr.msk.f32.gmra.mrb[6].mxu0 %vm409_vm4, %v358_v8  ;;  %v394_v50 = vld [vmem:[%s3233_s16 + $0x138] sm:$0xff]  ;;  %v395_v57 = vld [vmem:[%s3233_s16 + $0x140] sm:$0xff]  ;;  %v396_v0 = vld [vmem:[%s3233_s16 + $0x148] sm:$0xff] }
  0x20   : > { %2611 = vmatprep.mubr.msk.f32.mxu0 %vm3153_vm3, %v3154_v4  ;;  %v981_v6 = vld [vmem:[%s4525_s3 + $0x30] sm:$0xff]  ;;  %v982_v7 = vld [vmem:[%s4525_s3 + $0x38] sm:$0xff] }
  0x21   : > { %v2840_v8 = vpack.c.bf16 %v982_v7, %v981_v6 }
  0x23   : > { %2612 = vmatmul.mubr.msk.f32.gmra.mrb[8].mxu0 %vm409_vm4, %v359_v9  ;;  %v397_v9 = vld [vmem:[%s3233_s16 + $0x150] sm:$0xff]  ;;  %2841 = vmatpush3.bf16.msra.mxu1 %v2840_v8 }
  0x24   : > { %2614 = vmatprep.mubr.msk.f32.mxu0 %vm3153_vm3, %v3154_v4 }
  0x27   : > { %2615 = vmatmul.mubr.msk.f32.gmra.mrb[10].mxu0 %vm409_vm4, %v360_v10  ;;  %v999_v10 = vld [vmem:[%s4525_s3 + $0xc0] sm:$0xff] }
  0x28   : > { %2617 = vmatprep.mubr.msk.f32.mxu0 %vm3153_vm3, %v3154_v4 }
  0x2b   : > { %2618 = vmatmul.mubr.msk.f32.gmra.mrb[12].mxu0 %vm409_vm4, %v361_v11  ;;  %v1000_v11 = vld [vmem:[%s4525_s3 + $0xc8] sm:$0xff] }
  0x2c   : > { %2620 = vmatprep.mubr.msk.f32.mxu0 %vm3153_vm3, %v3154_v4 }
  0x2f   : > { %2621 = vmatmul.mubr.msk.f32.gmra.mrb[14].mxu0 %vm409_vm4, %v362_v12  ;;  %v2842_v12 = vpack.c.bf16 %v1000_v11, %v999_v10 }
  0x30   : > { %2623 = vmatprep.mubr.msk.f32.mxu0 %vm3153_vm3, %v3154_v4 }
  0x31   : > { %2843 = vmatprep.subr.bf16.mxu1 %v2842_v12 }
  0x33   : > { %2624 = vmatmul.mubr.msk.f32.gmra.mrb[16].mxu0 %vm409_vm4, %v363_v13  ;;  %v983_v13 = vld [vmem:[%s4525_s3 + $0x40] sm:$0xff] }
  0x34   : > { %2626 = vmatprep.mubr.msk.f32.mxu0 %vm3153_vm3, %v3154_v4 }
  0x37   : > { %2627 = vmatmul.mubr.msk.f32.gmra.mrb[18].mxu0 %vm409_vm4, %v364_v14  ;;  %v984_v14 = vld [vmem:[%s4525_s3 + $0x48] sm:$0xff] }
  0x38   : > { %2629 = vmatprep.mubr.msk.f32.mxu0 %vm3153_vm3, %v3154_v4 }
  0x3b   : > { %2630 = vmatmul.mubr.msk.f32.gmra.mrb[20].mxu0 %vm409_vm4, %v365_v15  ;;  %v2844_v15 = vpack.c.bf16 %v984_v14, %v983_v13 }
  0x3c   : > { %2632 = vmatprep.mubr.msk.f32.mxu0 %vm3153_vm3, %v3154_v4 }
  0x3d   : > { %2845 = vmatpush3.bf16.msra.mxu1 %v2844_v15 }
  0x3f   : > { %2633 = vmatmul.mubr.msk.f32.gmra.mrb[22].mxu0 %vm409_vm4, %v366_v16  ;;  %v398_v16 = vld [vmem:[%s3233_s16 + $0x158] sm:$0xff] }
  0x40   : > { %2635 = vmatprep.mubr.msk.f32.mxu0 %vm3153_vm3, %v3154_v4 }
  0x43   : > { %2636 = vmatmul.mubr.msk.f32.gmra.mrb[24].mxu0 %vm409_vm4, %v367_v17  ;;  %v1001_v17 = vld [vmem:[%s4525_s3 + $0xd0] sm:$0xff] }
  0x44   : > { %2638 = vmatprep.mubr.msk.f32.mxu0 %vm3153_vm3, %v3154_v4 }
  0x47   : > { %2639 = vmatmul.mubr.msk.f32.gmra.mrb[26].mxu0 %vm409_vm4, %v368_v18  ;;  %v1002_v18 = vld [vmem:[%s4525_s3 + $0xd8] sm:$0xff] }
  0x48   : > { %2641 = vmatprep.mubr.msk.f32.mxu0 %vm3153_vm3, %v3154_v4 }
  0x4b   : > { %2642 = vmatmul.mubr.msk.f32.gmra.mrb[28].mxu0 %vm409_vm4, %v369_v19  ;;  %v2846_v19 = vpack.c.bf16 %v1002_v18, %v1001_v17 }
  0x4c   : > { %2644 = vmatprep.mubr.msk.f32.mxu0 %vm3153_vm3, %v3154_v4 }
  0x4d   : > { %2847 = vmatprep.subr.bf16.mxu1 %v2846_v19 }
  0x4f   : > { %2645 = vmatmul.mubr.msk.f32.gmra.mrb[30].mxu0 %vm409_vm4, %v370_v20  ;;  %v985_v20 = vld [vmem:[%s4525_s3 + $0x50] sm:$0xff] }
  0x50   : > { %2647 = vmatprep.mubr.msk.f32.mxu0 %vm3153_vm3, %v3154_v4 }
  0x53   : > { %2648 = vmatmul.mubr.msk.f32.gmra.mrb[32].mxu0 %vm409_vm4, %v371_v21  ;;  %v986_v21 = vld [vmem:[%s4525_s3 + $0x58] sm:$0xff] }
  0x54   : > { %2650 = vmatprep.mubr.msk.f32.mxu0 %vm3153_vm3, %v3154_v4 }
  0x57   : > { %2651 = vmatmul.mubr.msk.f32.gmra.mrb[34].mxu0 %vm409_vm4, %v372_v22  ;;  %v2848_v22 = vpack.c.bf16 %v986_v21, %v985_v20 }
  0x58   : > { %2653 = vmatprep.mubr.msk.f32.mxu0 %vm3153_vm3, %v3154_v4 }
  0x59   : > { %2849 = vmatpush3.bf16.msra.mxu1 %v2848_v22 }
  0x5b   : > { %2654 = vmatmul.mubr.msk.f32.gmra.mrb[36].mxu0 %vm409_vm4, %v373_v23  ;;  %v399_v23 = vld [vmem:[%s3233_s16 + $0x160] sm:$0xff] }
  0x5c   : > { %2656 = vmatprep.mubr.msk.f32.mxu0 %vm3153_vm3, %v3154_v4 }
  0x5f   : > { %2657 = vmatmul.mubr.msk.f32.gmra.mrb[38].mxu0 %vm409_vm4, %v374_v24  ;;  %v1003_v24 = vld [vmem:[%s4525_s3 + $0xe0] sm:$0xff] }
  0x60   : > { %2659 = vmatprep.mubr.msk.f32.mxu0 %vm3153_vm3, %v3154_v4 }
  0x63   : > { %2660 = vmatmul.mubr.msk.f32.gmra.mrb[40].mxu0 %vm409_vm4, %v375_v25  ;;  %v1004_v25 = vld [vmem:[%s4525_s3 + $0xe8] sm:$0xff] }
  0x64   : > { %2662 = vmatprep.mubr.msk.f32.mxu0 %vm3153_vm3, %v3154_v4 }
  0x67   : > { %2663 = vmatmul.mubr.msk.f32.gmra.mrb[42].mxu0 %vm409_vm4, %v376_v26  ;;  %v2850_v26 = vpack.c.bf16 %v1004_v25, %v1003_v24  ;;  %v3564_v24 = vld [vmem:[%s4524_s2] ss:$0 sm:$0xff] }
  0x68   : > { %2665 = vmatprep.mubr.msk.f32.mxu0 %vm3153_vm3, %v3154_v4 }
  0x69   : > { %2851 = vmatprep.subr.bf16.mxu1 %v2850_v26 }
  0x6b   : > { %2666 = vmatmul.mubr.msk.f32.gmra.mrb[44].mxu0 %vm409_vm4, %v377_v27  ;;  %v987_v27 = vld [vmem:[%s4525_s3 + $0x60] sm:$0xff] }
  0x6c   : > { %2668 = vmatprep.mubr.msk.f32.mxu0 %vm3153_vm3, %v3154_v4 }
  0x6f   : > { %2669 = vmatmul.mubr.msk.f32.gmra.mrb[46].mxu0 %vm409_vm4, %v378_v28  ;;  %v988_v28 = vld [vmem:[%s4525_s3 + $0x68] sm:$0xff] }
  0x70   : > { %2671 = vmatprep.mubr.msk.f32.mxu0 %vm3153_vm3, %v3154_v4 }
  0x73   : > { %2672 = vmatmul.mubr.msk.f32.gmra.mrb[48].mxu0 %vm409_vm4, %v379_v29  ;;  %v2852_v29 = vpack.c.bf16 %v988_v28, %v987_v27  ;;  %v1007_v28 = vld [vmem:[%s4525_s3 + $0x100] sm:$0xff] }
  0x74   : > { %2674 = vmatprep.mubr.msk.f32.mxu0 %vm3153_vm3, %v3154_v4 }
  0x75   : > { %2853 = vmatpush3.bf16.msra.mxu1 %v2852_v29  ;;  %v1008_v29 = vld [vmem:[%s4525_s3 + $0x108] sm:$0xff] }
  0x77   : > { %2675 = vmatmul.mubr.msk.f32.gmra.mrb[50].mxu0 %vm409_vm4, %v380_v30  ;;  %v1005_v30 = vld [vmem:[%s4525_s3 + $0xf0] sm:$0xff] }
  0x78   : > { %2677 = vmatprep.mubr.msk.f32.mxu0 %vm3153_vm3, %v3154_v4 }
  0x7b   : > { %2678 = vmatmul.mubr.msk.f32.gmra.mrb[52].mxu0 %vm409_vm4, %v381_v31  ;;  %v1006_v31 = vld [vmem:[%s4525_s3 + $0xf8] sm:$0xff] }
  0x7c   : > { %2680 = vmatprep.mubr.msk.f32.mxu0 %vm3153_vm3, %v3154_v4 }
  0x7f   : > { %2681 = vmatmul.mubr.msk.f32.gmra.mrb[54].mxu0 %vm409_vm4, %v382_v32  ;;  %v2854_v32 = vpack.c.bf16 %v1006_v31, %v1005_v30 }
  0x80   : > { %2683 = vmatprep.mubr.msk.f32.mxu0 %vm3153_vm3, %v3154_v4 }
  0x81   : > { %2855 = vmatprep.subr.bf16.mxu1 %v2854_v32  ;;  %v1025_v32 = vld [vmem:[%s4525_s3 + $0x190] sm:$0xff] }
  0x83   : > { %2684 = vmatmul.mubr.msk.f32.gmra.mrb[56].mxu0 %vm409_vm4, %v383_v33  ;;  %v989_v33 = vld [vmem:[%s4525_s3 + $0x70] sm:$0xff] }
  0x84   : > { %2686 = vmatprep.mubr.msk.f32.mxu0 %vm3153_vm3, %v3154_v4 }
  0x87   : > { %2687 = vmatmul.mubr.msk.f32.gmra.mrb[58].mxu0 %vm409_vm4, %v384_v34  ;;  %v990_v34 = vld [vmem:[%s4525_s3 + $0x78] sm:$0xff] }
  0x88   : > { %2689 = vmatprep.mubr.msk.f32.mxu0 %vm3153_vm3, %v3154_v4 }
  0x8b   : > { %2690 = vmatmul.mubr.msk.f32.gmra.mrb[60].mxu0 %vm409_vm4, %v385_v35  ;;  %v2856_v35 = vpack.c.bf16 %v990_v34, %v989_v33  ;;  %v1026_v33 = vld [vmem:[%s4525_s3 + $0x198] sm:$0xff] }
  0x8c   : > { %2692 = vmatprep.mubr.msk.f32.mxu0 %vm3153_vm3, %v3154_v4 }
  0x8d   : > { %2857 = vmatpush3.bf16.msra.mxu1 %v2856_v35  ;;  %v2860_v35 = vpack.c.bf16 %v1008_v29, %v1007_v28  ;;  %v1031_v28 = vld [vmem:[%s4525_s3 + $0x1c0] sm:$0xff] }
  0x8e   : > { %2859 = vmatprep.subr.bf16.mxu1 %v2858_v46  ;;  %v1027_v46 = vld [vmem:[%s4525_s3 + $0x1a0] sm:$0xff] }
  0x8f   : > { %2693 = vmatmul.mubr.msk.f32.gmra.mrb[62].mxu0 %vm409_vm4, %v386_v36 }
  0x90   : > { %2695 = vmatprep.mubr.msk.f32.mxu0 %vm3153_vm3, %v3154_v4 }
  0x93   : > { %2696 = vmatmul.mubr.msk.f32.gmra.mrb[64].mxu0 %vm409_vm4, %v387_v37 }
  0x94   : > { %2698 = vmatprep.mubr.msk.f32.mxu0 %vm3153_vm3, %v3154_v4 }
  0x97   : > { %2699 = vmatmul.mubr.msk.f32.gmra.mrb[66].mxu0 %vm409_vm4, %v388_v38 }
  0x98   : > { %2701 = vmatprep.mubr.msk.f32.mxu0 %vm3153_vm3, %v3154_v4 }
  0x9b   : > { %2702 = vmatmul.mubr.msk.f32.gmra.mrb[68].mxu0 %vm409_vm4, %v389_v39 }
  0x9c   : > { %2704 = vmatprep.mubr.msk.f32.mxu0 %vm3153_vm3, %v3154_v4 }
  0x9f   : > { %2705 = vmatmul.mubr.msk.f32.gmra.mrb[70].mxu0 %vm409_vm4, %v390_v40 }
  0xa0   : > { %2707 = vmatprep.mubr.msk.f32.mxu0 %vm3153_vm3, %v3154_v4 }
  0xa3   : > { %2708 = vmatmul.mubr.msk.f32.gmra.mrb[72].mxu0 %vm409_vm4, %v391_v41 }
  0xa4   : > { %2710 = vmatprep.mubr.msk.f32.mxu0 %vm3153_vm3, %v3154_v4 }
  0xa7   : > { %2711 = vmatmul.mubr.msk.f32.gmra.mrb[74].mxu0 %vm409_vm4, %v392_v42 }
  0xa8   : > { %2713 = vmatprep.mubr.msk.f32.mxu0 %vm3153_vm3, %v3154_v4 }
  0xab   : > { %2714 = vmatmul.mubr.msk.f32.gmra.mrb[76].mxu0 %vm409_vm4, %v393_v43 }
  0xac   : > { %2716 = vmatprep.mubr.msk.f32.mxu0 %vm3153_vm3, %v3154_v4 }
  0xaf   : > { %2717 = vmatmul.mubr.msk.f32.gmra.mrb[78].mxu0 %vm409_vm4, %v394_v50 }
  0xb0   : > { %2719 = vmatprep.mubr.msk.f32.mxu0 %vm3153_vm3, %v3154_v4 }
  0xb3   : > { %2720 = vmatmul.mubr.msk.f32.gmra.mrb[80].mxu0 %vm409_vm4, %v395_v57 }
  0xb4   : > { %2722 = vmatprep.mubr.msk.f32.mxu0 %vm3153_vm3, %v3154_v4 }
  0xb7   : > { %2723 = vmatmul.mubr.msk.f32.gmra.mrb[82].mxu0 %vm409_vm4, %v396_v0 }
  0xb8   : > { %2725 = vmatprep.mubr.msk.f32.mxu0 %vm3153_vm3, %v3154_v4 }
  0xbb   : > { %2726 = vmatmul.mubr.msk.f32.gmra.mrb[84].mxu0 %vm409_vm4, %v397_v9 }
  0xbc   : > { %2728 = vmatprep.mubr.msk.f32.mxu0 %vm3153_vm3, %v3154_v4 }
  0xbf   : > { %2729 = vmatmul.mubr.msk.f32.gmra.mrb[86].mxu0 %vm409_vm4, %v398_v16 }
  0xc0   : > { %2731 = vmatprep.mubr.msk.f32.mxu0 %vm3153_vm3, %v3154_v4 }
  0xc3   : > { %2732 = vmatmul.mubr.msk.f32.gmra.mrb[88].mxu0 %vm409_vm4, %v399_v23 }
  0xe6   : > { %v615_v36 = vpop.f32.mrb[0].mxu0 }
  0xe7   : > { %v2601_v37 = vpop.f32.mrb[1].mxu0  ;;  %v3567_v26 = vadd.f32 %v3564_v24, %v615_v36 }
  0xe9   : > { %v839_v36 = vmax.f32 %v3567_v26, 0.0 }
  0xea   : > { %v3509_v38 = vpop.f32.mrb[2].mxu0 }
  0xeb   : > { %v2604_v39 = vpop.f32.mrb[3].mxu0 }
  0xec   : > { %v2862_v39 = vpack.c.bf16 %v1026_v33, %v1025_v32 }
  0xee   : > { %v3511_v40 = vpop.f32.mrb[4].mxu0 }
  0xef   : > { %v2607_v41 = vpop.f32.mrb[5].mxu0 }
  0xf0   : > { %v1009_v41 = vld [vmem:[%s4525_s3 + $0x110] sm:$0xff] }
  0xf2   : > { %v3513_v42 = vpop.f32.mrb[6].mxu0 }
  0xf3   : > { %v2610_v43 = vpop.f32.mrb[7].mxu0 }
  0xf4   : > { %v1010_v43 = vld [vmem:[%s4525_s3 + $0x118] sm:$0xff] }
  0xf6   : > { %v3521_v47 = vpop.f32.mrb[8].mxu0 }
  0xf7   : > { %v2613_v48 = vpop.f32.mrb[9].mxu0 }
  0xf8   : > { %v1028_v48 = vld [vmem:[%s4525_s3 + $0x1a8] sm:$0xff] }
  0xfa   : > { %v3523_v49 = vpop.f32.mrb[10].mxu0 }
  0xfb   : > { %v2616_v50 = vpop.f32.mrb[11].mxu0 }
  0xfe   : > { %v3525_v51 = vpop.f32.mrb[12].mxu0 }
  0xff   : > { %v2619_v52 = vpop.f32.mrb[13].mxu0 }
 0x100   : > { %v2864_v52 = vpack.c.bf16 %v1010_v43, %v1009_v41  ;;  %v1033_v41 = vld [vmem:[%s4525_s3 + $0x1d0] sm:$0xff]  ;;  %v1034_v43 = vld [vmem:[%s4525_s3 + $0x1d8] sm:$0xff] }
 0x102   : > { %v3527_v53 = vpop.f32.mrb[14].mxu0 }
 0x103   : > { %v2622_v54 = vpop.f32.mrb[15].mxu0 }
 0x106   : > { %v3529_v55 = vpop.f32.mrb[16].mxu0 }
 0x107   : > { %v2625_v56 = vpop.f32.mrb[17].mxu0 }
 0x108   : > { %v2866_v56 = vpack.c.bf16 %v1028_v48, %v1027_v46  ;;  %v2878_v48 = vpack.c.bf16 %v1034_v43, %v1033_v41 }
 0x10a   : > { %v3531_v57 = vpop.f32.mrb[18].mxu0 }
 0x10b   : > { %v2628_v58 = vpop.f32.mrb[19].mxu0 }
 0x10c   : > { %v1011_v58 = vld [vmem:[%s4525_s3 + $0x120] sm:$0xff] }
 0x10e   : > { %v3533_v59 = vpop.f32.mrb[20].mxu0 }
 0x10f   : > { %v2631_v60 = vpop.f32.mrb[21].mxu0 }
 0x110   : > { %v1012_v60 = vld [vmem:[%s4525_s3 + $0x128] sm:$0xff] }
 0x112   : > { %v3535_v61 = vpop.f32.mrb[22].mxu0 }
 0x113   : > { %v2634_v62 = vpop.f32.mrb[23].mxu0 }
 0x116   : > { %v3537_v63 = vpop.f32.mrb[24].mxu0 }
 0x117   : > { %v2637_v0 = vpop.f32.mrb[25].mxu0 }
 0x11a   : > { %v3539_v1 = vpop.f32.mrb[26].mxu0 }
 0x11b   : > { %v2640_v3 = vpop.f32.mrb[27].mxu0 }
 0x11e   : > { %v3541_v5 = vpop.f32.mrb[28].mxu0 }
 0x11f   : > { %v2643_v6 = vpop.f32.mrb[29].mxu0 }
 0x120   : > { %v1029_v6 = vld [vmem:[%s4525_s3 + $0x1b0] sm:$0xff] }
 0x122   : > { %v3543_v7 = vpop.f32.mrb[30].mxu0 }
 0x123   : > { %v2646_v8 = vpop.f32.mrb[31].mxu0 }
 0x124   : > { %v1030_v8 = vld [vmem:[%s4525_s3 + $0x1b8] sm:$0xff] }
 0x126   : > { %v3545_v9 = vpop.f32.mrb[32].mxu0 }
 0x127   : > { %v2649_v10 = vpop.f32.mrb[33].mxu0 }
 0x128   : > { %v2868_v10 = vpack.c.bf16 %v1012_v60, %v1011_v58 }
 0x12a   : > { %v3547_v11 = vpop.f32.mrb[34].mxu0 }
 0x12b   : > { %v2652_v12 = vpop.f32.mrb[35].mxu0 }
 0x12e   : > { %v3549_v13 = vpop.f32.mrb[36].mxu0 }
 0x12f   : > { %v2655_v14 = vpop.f32.mrb[37].mxu0 }
 0x130   : > { %v631_v14 = vadd.f32 %v3564_v24, %v3513_v42  ;;  %v1032_v42 = vld [vmem:[%s4525_s3 + $0x1c8] sm:$0xff] }
 0x131   : > { %v2874_v33 = vpack.c.bf16 %v1032_v42, %v1031_v28 }
 0x132   : > { %v3551_v15 = vpop.f32.mrb[38].mxu0 }
 0x133   : > { %v2658_v16 = vpop.f32.mrb[39].mxu0 }
 0x136   : > { %v3553_v17 = vpop.f32.mrb[40].mxu0 }
 0x137   : > { %v2661_v18 = vpop.f32.mrb[41].mxu0 }
 0x138   : > { %v2870_v18 = vpack.c.bf16 %v1030_v8, %v1029_v6  ;;  %v646_v8 = vadd.f32 %v3564_v24, %v3525_v51  ;;  %v1038_v51 = vld [vmem:[%s4525_s3 + $0x1f8] sm:$0xff] }
 0x13a   : > { %v3555_v19 = vpop.f32.mrb[42].mxu0  ;;  %v3678_v42 = vmax.f32 %v646_v8, 0.0 }
 0x13b   : > { %v2664_v20 = vpop.f32.mrb[43].mxu0 }
 0x13c   : > { %v1013_v20 = vld [vmem:[%s4525_s3 + $0x130] sm:$0xff] }
 0x13e   : > { %v3557_v21 = vpop.f32.mrb[44].mxu0 }
 0x13f   : > { %v2667_v22 = vpop.f32.mrb[45].mxu0 }
 0x140   : > { %v1014_v22 = vld [vmem:[%s4525_s3 + $0x138] sm:$0xff] }
 0x142   : > { %v3559_v23 = vpop.f32.mrb[46].mxu0 }
 0x143   : > { %v2670_v25 = vpop.f32.mrb[47].mxu0 }
 0x146   : > { %v735_v27 = vpop.f32.mrb[48].mxu0 }
 0x147   : > { %v736_v30 = vadd.f32 %v3564_v24, %v735_v27  ;;  %v2673_v31 = vpop.f32.mrb[49].mxu0 }
 0x148   : > { %v3630_v31 = vmax.f32 %v631_v14, 0.0 }
 0x149   : > { %v863_v34 = vmax.f32 %v736_v30, 0.0  ;;  %v2872_v30 = vpack.c.bf16 %v1014_v22, %v1013_v20 }
 0x14a   : > { %v740_v37 = vpop.f32.mrb[50].mxu0 }
 0x14b   : > { %v741_v44 = vadd.f32 %v3564_v24, %v740_v37  ;;  %v2676_v45 = vpop.f32.mrb[51].mxu0  ;;  %1190 = vmatprep.mubr.f32.mxu1 %v863_v34  ;;  %v941_v62 = vrot.slane %v863_v34, 1  ;;  %v1015_v34 = vld [vmem:[%s4525_s3 + $0x140] sm:$0xff] }
 0x14c   : > { %1191 = vmatmul.mubr.f32.vlgmr.msra.gmra.mrb[0].mxu1 %v839_v36 }
 0x14d   : > { %v864_v50 = vmax.f32 %v741_v44, 0.0  ;;  %2861 = vmatpush3.bf16.msra.mxu1 %v2860_v35  ;;  %v1016_v35 = vld [vmem:[%s4525_s3 + $0x148] sm:$0xff] }
 0x14e   : > { %v3598_v54 = vpop.f32.mrb[52].mxu0  ;;  %2863 = vmatprep.subr.bf16.mxu1 %v2862_v39  ;;  %v2876_v45 = vpack.c.bf16 %v1016_v35, %v1015_v34 }
 0x14f   : > { %v942_v0 = vrot.slane %v864_v50, 1  ;;  %v2679_v3 = vpop.f32.mrb[53].mxu0  ;;  %v1017_v50 = vld [vmem:[%s4525_s3 + $0x150] sm:$0xff] }
 0x151   : > { %2865 = vmatpush3.bf16.msra.mxu1 %v2864_v52  ;;  %v3613_v12 = vsel %vm898_vm5, %v941_v62, %v942_v0  ;;  %v1018_v52 = vld [vmem:[%s4525_s3 + $0x158] sm:$0xff]  ;;  %v1035_v62 = vld [vmem:[%s4525_s3 + $0x1e0] sm:$0xff]  ;;  %v1036_v0 = vld [vmem:[%s4525_s3 + $0x1e8] sm:$0xff] }
 0x152   : > { %v750_v16 = vpop.f32.mrb[54].mxu0  ;;  %2867 = vmatprep.subr.bf16.mxu1 %v2866_v56  ;;  %v2880_v3 = vpack.c.bf16 %v1018_v52, %v1017_v50  ;;  %v2882_v14 = vpack.c.bf16 %v1036_v0, %v1035_v62 }
 0x153   : > { %v751_v25 = vadd.f32 %v3564_v24, %v750_v16  ;;  %v2682_v27 = vpop.f32.mrb[55].mxu0  ;;  %v1019_v16 = vld [vmem:[%s4525_s3 + $0x160] sm:$0xff] }
 0x155   : > { %v866_v29 = vmax.f32 %v751_v25, 0.0  ;;  %2869 = vmatpush3.bf16.msra.mxu1 %v2868_v10  ;;  %v1037_v25 = vld [vmem:[%s4525_s3 + $0x1f0] sm:$0xff] }
 0x156   : > { %v755_v32 = vpop.f32.mrb[56].mxu0  ;;  %2871 = vmatprep.subr.bf16.mxu1 %v2870_v18  ;;  %v1020_v18 = vld [vmem:[%s4525_s3 + $0x168] sm:$0xff] }
 0x157   : > { %v756_v37 = vadd.f32 %v3564_v24, %v755_v32  ;;  %v2685_v39 = vpop.f32.mrb[57].mxu0  ;;  %1195 = vmatprep.mubr.f32.mxu1 %v866_v29  ;;  %v944_v56 = vrot.slane %v866_v29, 1  ;;  %v2884_v28 = vpack.c.bf16 %v1020_v18, %v1019_v16  ;;  %v1021_v32 = vld [vmem:[%s4525_s3 + $0x170] sm:$0xff] }
 0x158   : > { %1196 = vmatmul.mubr.f32.gmra.mrb[2].mxu1 %v3630_v31  ;;  %v1056_v39 = vld [vmem:[%s4525_s3 + $0x288] sm:$0xff] }
 0x159   : > { %v867_v44 = vmax.f32 %v756_v37, 0.0  ;;  %2873 = vmatpush3.bf16.msra.mxu1 %v2872_v30  ;;  %v2886_v30 = vpack.c.bf16 %v1038_v51, %v1037_v25  ;;  %v1055_v37 = vld [vmem:[%s4525_s3 + $0x280] sm:$0xff] }
 0x15a   : > { %v3646_v46 = vpop.f32.mrb[58].mxu0  ;;  %2875 = vmatprep.subr.bf16.mxu1 %v2874_v33  ;;  %v1022_v33 = vld [vmem:[%s4525_s3 + $0x178] sm:$0xff] }
 0x15b   : > { %v945_v58 = vrot.slane %v867_v44, 1  ;;  %v2688_v60 = vpop.f32.mrb[59].mxu0  ;;  %v2888_v43 = vpack.c.bf16 %v1022_v33, %v1021_v32 }
 0x15d   : > { %2877 = vmatpush3.bf16.msra.mxu1 %v2876_v45  ;;  %v3661_v6 = vsel %vm898_vm5, %v944_v56, %v945_v58  ;;  %v2890_v45 = vpack.c.bf16 %v1056_v39, %v1055_v37  ;;  %v661_v58 = vadd.f32 %v3564_v24, %v3531_v57 }
 0x15e   : > { %v765_v10 = vpop.f32.mrb[60].mxu0  ;;  %2879 = vmatprep.subr.bf16.mxu1 %v2878_v48 }
 0x15f   : > { %v766_v20 = vadd.f32 %v3564_v24, %v765_v10  ;;  %v2691_v22 = vpop.f32.mrb[61].mxu0  ;;  %v3702_v8 = vmax.f32 %v661_v58, 0.0 }
 0x161   : > { %v869_v27 = vmax.f32 %v766_v20, 0.0  ;;  %2881 = vmatpush3.bf16.msra.mxu1 %v2880_v3 }
 0x162   : > { %v770_v29 = vpop.f32.mrb[62].mxu0  ;;  %2883 = vmatprep.subr.bf16.mxu1 %v2882_v14 }
 0x163   : > { %v771_v34 = vadd.f32 %v3564_v24, %v770_v29  ;;  %v2694_v35 = vpop.f32.mrb[63].mxu0  ;;  %1200 = vmatprep.mubr.f32.mxu1 %v869_v27  ;;  %v947_v48 = vrot.slane %v869_v27, 1  ;;  %v676_v27 = vadd.f32 %v3564_v24, %v3537_v63 }
 0x164   : > { %1201 = vmatmul.mubr.f32.gmra.mrb[4].mxu1 %v3678_v42 }
 0x165   : > { %v870_v41 = vmax.f32 %v771_v34, 0.0  ;;  %2885 = vmatpush3.bf16.msra.mxu1 %v2884_v28  ;;  %v3714_v33 = vmax.f32 %v676_v27, 0.0  ;;  %v706_v27 = vadd.f32 %v3564_v24, %v3549_v13 }
 0x166   : > { %v3694_v44 = vpop.f32.mrb[64].mxu0  ;;  %2887 = vmatprep.subr.bf16.mxu1 %v2886_v30 }
 0x167   : > { %v948_v50 = vrot.slane %v870_v41, 1  ;;  %v2697_v52 = vpop.f32.mrb[65].mxu0 }
 0x169   : > { %2889 = vmatpush3.bf16.msra.mxu1 %v2888_v43  ;;  %v3697_v56 = vsel %vm898_vm5, %v947_v48, %v948_v50  ;;  %v691_v50 = vadd.f32 %v3564_v24, %v3543_v7 }
 0x16a   : > { %v780_v60 = vpop.f32.mrb[66].mxu0  ;;  %2891 = vmatprep.subr.bf16.mxu1 %v2890_v45 }
 0x16b   : > { %v781_v62 = vadd.f32 %v3564_v24, %v780_v60  ;;  %v2700_v0 = vpop.f32.mrb[67].mxu0 }
 0x16c   : > { %v3726_v0 = vmax.f32 %v691_v50, 0.0  ;;  %v1058_v50 = vld [vmem:[%s4525_s3 + $0x298] sm:$0xff] }
 0x16d   : > { %v872_v3 = vmax.f32 %v781_v62, 0.0 }
 0x16e   : > { %v785_v10 = vpop.f32.mrb[68].mxu0 }
 0x16f   : > { %v786_v14 = vadd.f32 %v3564_v24, %v785_v10  ;;  %v2703_v16 = vpop.f32.mrb[69].mxu0  ;;  %1205 = vmatprep.mubr.f32.mxu1 %v872_v3  ;;  %v950_v22 = vrot.slane %v872_v3, 1 }
 0x170   : > { %1206 = vmatmul.mubr.f32.gmra.mrb[6].mxu1 %v3702_v8 }
 0x171   : > { %v873_v18 = vmax.f32 %v786_v14, 0.0 }
 0x172   : > { %v3706_v20 = vpop.f32.mrb[70].mxu0 }
 0x173   : > { %v951_v57 = vrot.slane %v873_v18, 1  ;;  %v2706_v25 = vpop.f32.mrb[71].mxu0 }
 0x175   : > { %v3709_v51 = vsel %vm898_vm5, %v950_v22, %v951_v57 }
 0x176   : > { %v795_v28 = vpop.f32.mrb[72].mxu0 }
 0x177   : > { %v796_v29 = vadd.f32 %v3564_v24, %v795_v28  ;;  %v2709_v30 = vpop.f32.mrb[73].mxu0 }
 0x179   : > { %v875_v32 = vmax.f32 %v796_v29, 0.0  ;;  %v626_v29 = vadd.f32 %v3564_v24, %v3511_v40 }
 0x17a   : > { %v800_v34 = vpop.f32.mrb[74].mxu0 }
 0x17b   : > { %v801_v35 = vadd.f32 %v3564_v24, %v800_v34  ;;  %v2712_v37 = vpop.f32.mrb[75].mxu0  ;;  %1210 = vmatprep.mubr.f32.mxu1 %v875_v32  ;;  %v953_v43 = vrot.slane %v875_v32, 1  ;;  %v841_v13 = vmax.f32 %v626_v29, 0.0 }
 0x17c   : > { %1211 = vmatmul.mubr.f32.gmra.mrb[8].mxu1 %v3714_v33 }
 0x17d   : > { %v876_v39 = vmax.f32 %v801_v35, 0.0  ;;  %v3740_v35 = vmax.f32 %v706_v27, 0.0  ;;  %v1060_v27 = vld [vmem:[%s4525_s3 + $0x2a8] sm:$0xff] }
 0x17e   : > { %v3718_v41 = vpop.f32.mrb[76].mxu0 }
 0x17f   : > { %v954_v45 = vrot.slane %v876_v39, 1  ;;  %v2715_v63 = vpop.f32.mrb[77].mxu0  ;;  %v1039_v39 = vld [vmem:[%s4525_s3 + $0x200] sm:$0xff] }
 0x180   : > { %v1057_v63 = vld [vmem:[%s4525_s3 + $0x290] sm:$0xff] }
 0x181   : > { %v3721_v48 = vsel %vm898_vm5, %v953_v43, %v954_v45  ;;  %v1040_v43 = vld [vmem:[%s4525_s3 + $0x208] sm:$0xff]  ;;  %v3750_v45 = vadd.f32 %v3564_v24, %v3523_v49  ;;  %v1041_v49 = vld [vmem:[%s4525_s3 + $0x210] sm:$0xff] }
 0x182   : > { %v810_v52 = vpop.f32.mrb[78].mxu0 }
 0x183   : > { %v811_v58 = vadd.f32 %v3564_v24, %v810_v52  ;;  %v2718_v60 = vpop.f32.mrb[79].mxu0 }
 0x184   : > { %v2892_v60 = vpack.c.bf16 %v1040_v43, %v1039_v39  ;;  %v3794_v39 = vadd.f32 %v3564_v24, %v3535_v61  ;;  %v1061_v43 = vld [vmem:[%s4525_s3 + $0x2b0] sm:$0xff] }
 0x185   : > { %v878_v62 = vmax.f32 %v811_v58, 0.0  ;;  %v1045_v61 = vld [vmem:[%s4525_s3 + $0x230] sm:$0xff] }
 0x186   : > { %v815_v3 = vpop.f32.mrb[80].mxu0 }
 0x187   : > { %v816_v10 = vadd.f32 %v3564_v24, %v815_v3  ;;  %v2721_v14 = vpop.f32.mrb[81].mxu0  ;;  %1215 = vmatprep.mubr.f32.mxu1 %v878_v62  ;;  %v956_v22 = vrot.slane %v878_v62, 1  ;;  %v2894_v62 = vpack.c.bf16 %v1058_v50, %v1057_v63  ;;  %v1042_v3 = vld [vmem:[%s4525_s3 + $0x218] sm:$0xff] }
 0x188   : > { %1216 = vmatmul.mubr.f32.gmra.mrb[10].mxu1 %v3726_v0  ;;  %v844_v14 = vmax.f32 %v3750_v45, 0.0  ;;  %v2896_v29 = vpack.c.bf16 %v1042_v3, %v1041_v49  ;;  %v1046_v50 = vld [vmem:[%s4525_s3 + $0x238] sm:$0xff] }
 0x189   : > { %v879_v16 = vmax.f32 %v816_v10, 0.0  ;;  %v2904_v49 = vpack.c.bf16 %v1046_v50, %v1045_v61  ;;  %v1050_v61 = vld [vmem:[%s4525_s3 + $0x258] sm:$0xff] }
 0x18a   : > { %v3730_v18 = vpop.f32.mrb[82].mxu0  ;;  %v1090_v45 = vld [vmem:[%s4525_s3 + $0x398] sm:$0xff] }
 0x18b   : > { %v957_v57 = vrot.slane %v879_v16, 1  ;;  %v2724_v7 = vpop.f32.mrb[83].mxu0  ;;  %v3771_v16 = vadd.f32 %v3564_v24, %v3529_v55 }
 0x18c   : > { %v1059_v7 = vld [vmem:[%s4525_s3 + $0x2a0] sm:$0xff] }
 0x18d   : > { %v3733_v25 = vsel %vm898_vm5, %v956_v22, %v957_v57 }
 0x18e   : > { %v825_v28 = vpop.f32.mrb[84].mxu0 }
 0x18f   : > { %v826_v30 = vadd.f32 %v3564_v24, %v825_v28  ;;  %v2727_v32 = vpop.f32.mrb[85].mxu0 }
 0x190   : > { %v1043_v32 = vld [vmem:[%s4525_s3 + $0x220] sm:$0xff] }
 0x191   : > { %v881_v34 = vmax.f32 %v826_v30, 0.0  ;;  %v2898_v30 = vpack.c.bf16 %v1060_v27, %v1059_v7  ;;  %v1066_v7 = vld [vmem:[%s4525_s3 + $0x2d8] sm:$0xff] }
 0x192   : > { %v830_v37 = vpop.f32.mrb[86].mxu0 }
 0x193   : > { %v831_v40 = vadd.f32 %v3564_v24, %v830_v37  ;;  %1220 = vmatprep.mubr.f32.mxu1 %v881_v34  ;;  %v2730_v52 = vpop.f32.mrb[87].mxu0  ;;  %v959_v22 = vrot.slane %v881_v34, 1  ;;  %v1044_v34 = vld [vmem:[%s4525_s3 + $0x228] sm:$0xff]  ;;  %v847_v37 = vmax.f32 %v3771_v16, 0.0  ;;  %v1093_v16 = vld [vmem:[%s4525_s3 + $0x3b0] sm:$0xff] }
 0x194   : > { %1221 = vmatmul.mubr.f32.gmra.mrb[12].mxu1 %v3740_v35  ;;  %v850_v52 = vmax.f32 %v3794_v39, 0.0  ;;  %v1095_v39 = vld [vmem:[%s4525_s3 + $0x3c0] sm:$0xff] }
 0x195   : > { %v882_v58 = vmax.f32 %v831_v40, 0.0  ;;  %1290 = vmatprep.mubr.f32.mxu1 %v841_v13  ;;  %v1062_v13 = vld [vmem:[%s4525_s3 + $0x2b8] sm:$0xff]  ;;  %v2900_v40 = vpack.c.bf16 %v1044_v34, %v1043_v32  ;;  %v1633_v32 = vld [vmem:[%s4527_s5] sm:$0xff] }
 0x196   : > { %v3766_v10 = vpop.f32.mrb[88].mxu0  ;;  %v2902_v63 = vpack.c.bf16 %v1062_v13, %v1061_v43 }
 0x197   : > { %v960_v57 = vrot.slane %v882_v58, 1  ;;  %v2733_v28 = vpop.f32.mrb[89].mxu0  ;;  %v3814_v58 = vadd.f32 %v3564_v24, %v3541_v5  ;;  %v1047_v5 = vld [vmem:[%s4525_s3 + $0x240] sm:$0xff] }
 0x198   : > { %1291 = vmatmul.mubr.f32.vlgmr.msra.gmra.mrb[14].mxu1 %v3630_v31  ;;  %v3840_v28 = vadd.f32 %v3564_v24, %v3547_v11  ;;  %v1634_v11 = vld [vmem:[%s4527_s5 + $0x8] sm:$0xff] }
 0x199   : > { %2893 = vmatpush3.bf16.msra.mxu1 %v2892_v60  ;;  %1295 = vmatprep.mubr.f32.mxu1 %v844_v14  ;;  %v3783_v55 = vsel %vm898_vm5, %v959_v22, %v960_v57  ;;  %v1063_v60 = vld [vmem:[%s4525_s3 + $0x2c0] sm:$0xff]  ;;  %v1048_v22 = vld [vmem:[%s4525_s3 + $0x248] sm:$0xff]  ;;  %v1065_v57 = vld [vmem:[%s4525_s3 + $0x2d0] sm:$0xff]  ;;  %v853_v27 = vmax.f32 %v3814_v58, 0.0  ;;  %v2980_v13 = vpack.c.bf16 %v1634_v11, %v1633_v32 }
 0x19a   : > { %2895 = vmatprep.subr.bf16.mxu1 %v2894_v62  ;;  %v1064_v62 = vld [vmem:[%s4525_s3 + $0x2c8] sm:$0xff]  ;;  %v2908_v43 = vpack.c.bf16 %v1048_v22, %v1047_v5  ;;  %v856_v50 = vmax.f32 %v3840_v28, 0.0  ;;  %v1051_v22 = vld [vmem:[%s4525_s3 + $0x260] sm:$0xff]  ;;  %v1053_v11 = vld [vmem:[%s4525_s3 + $0x270] sm:$0xff]  ;;  %v731_v28 = vadd.f32 %v3564_v24, %v3559_v23 }
 0x19b   : > { %v2906_v3 = vpack.c.bf16 %v1064_v62, %v1063_v60  ;;  %v3866_v60 = vadd.f32 %v3564_v24, %v3553_v17  ;;  %v1067_v62 = vld [vmem:[%s4525_s3 + $0x2e0] sm:$0xff]  ;;  %v3879_v17 = vadd.f32 %v3564_v24, %v3555_v19  ;;  %v1070_v19 = vld [vmem:[%s4525_s3 + $0x2f8] sm:$0xff]  ;;  %v1097_v58 = vld [vmem:[%s4525_s3 + $0x3d0] sm:$0xff] }
 0x19c   : > { %1296 = vmatmul.mubr.f32.gmra.mrb[16].mxu1 %v3678_v42 }
 0x19d   : > { %2897 = vmatpush3.bf16.msra.mxu1 %v2896_v29  ;;  %1300 = vmatprep.mubr.f32.mxu1 %v847_v37  ;;  %v1649_v29 = vld [vmem:[%s4527_s5 + $0x80] sm:$0xff]  ;;  %v860_v32 = vmax.f32 %v3879_v17, 0.0 }
 0x19e   : > { %2899 = vmatprep.subr.bf16.mxu1 %v2898_v30  ;;  %v1650_v30 = vld [vmem:[%s4527_s5 + $0x88] sm:$0xff] }
 0x19f   : > { %v2978_v34 = vpack.c.bf16 %v1650_v30, %v1649_v29  ;;  %v1069_v29 = vld [vmem:[%s4525_s3 + $0x2f0] sm:$0xff] }
 0x1a0   : > { %1301 = vmatmul.mubr.f32.gmra.mrb[18].mxu1 %v3702_v8 }
 0x1a1   : > { %2901 = vmatpush3.bf16.msra.mxu1 %v2900_v40  ;;  %1305 = vmatprep.mubr.f32.mxu1 %v850_v52  ;;  %v2910_v40 = vpack.c.bf16 %v1066_v7, %v1065_v57  ;;  %v1052_v57 = vld [vmem:[%s4525_s3 + $0x268] sm:$0xff]  ;;  %v859_v7 = vmax.f32 %v3866_v60, 0.0  ;;  %v1101_v60 = vld [vmem:[%s4525_s3 + $0x3f0] sm:$0xff] }
 0x1a2   : > { %2903 = vmatprep.subr.bf16.mxu1 %v2902_v63  ;;  %v1049_v63 = vld [vmem:[%s4525_s3 + $0x250] sm:$0xff]  ;;  %2979 = vmatprep.subr.bf16.mxu0 %v2978_v34  ;;  %v2916_v30 = vpack.c.bf16 %v1052_v57, %v1051_v22  ;;  %v2918_v34 = vpack.c.bf16 %v1070_v19, %v1069_v29  ;;  %v761_v22 = vadd.f32 %v3564_v24, %v3646_v46  ;;  %v1074_v19 = vld [vmem:[%s4525_s3 + $0x318] sm:$0xff] }
 0x1a3   : > { %2981 = vmatpush3.bf16.msra.mxu0 %v2980_v13  ;;  %v2912_v5 = vpack.c.bf16 %v1050_v61, %v1049_v63  ;;  %v1087_v13 = vld [vmem:[%s4525_s3 + $0x380] sm:$0xff]  ;;  %v746_v61 = vadd.f32 %v3564_v24, %v3598_v54  ;;  %v1073_v29 = vld [vmem:[%s4525_s3 + $0x310] sm:$0xff] }
 0x1a4   : > { %1306 = vmatmul.mubr.f32.gmra.mrb[20].mxu1 %v3714_v33  ;;  %v2928_v46 = vpack.c.bf16 %v1074_v19, %v1073_v29  ;;  %v1078_v29 = vld [vmem:[%s4525_s3 + $0x338] sm:$0xff] }
 0x1a5   : > { %2905 = vmatpush3.bf16.msra.mxu1 %v2904_v49  ;;  %1310 = vmatprep.mubr.f32.mxu1 %v853_v27  ;;  %v1068_v49 = vld [vmem:[%s4525_s3 + $0x2e8] sm:$0xff] }
 0x1a6   : > { %2907 = vmatprep.subr.bf16.mxu1 %v2906_v3  ;;  %v2914_v3 = vpack.c.bf16 %v1068_v49, %v1067_v62  ;;  %v1071_v49 = vld [vmem:[%s4525_s3 + $0x300] sm:$0xff] }
 0x1a8   : > { %1311 = vmatmul.mubr.f32.gmra.mrb[22].mxu1 %v3726_v0 }
 0x1a9   : > { %2909 = vmatpush3.bf16.msra.mxu1 %v2908_v43  ;;  %1315 = vmatprep.mubr.f32.mxu1 %v856_v50  ;;  %v1054_v43 = vld [vmem:[%s4525_s3 + $0x278] sm:$0xff] }
 0x1aa   : > { %2911 = vmatprep.subr.bf16.mxu1 %v2910_v40  ;;  %v1088_v40 = vld [vmem:[%s4525_s3 + $0x388] sm:$0xff]  ;;  %v2920_v63 = vpack.c.bf16 %v1054_v43, %v1053_v11  ;;  %v1075_v11 = vld [vmem:[%s4525_s3 + $0x320] sm:$0xff]  ;;  %v868_v43 = vmax.f32 %v761_v22, 0.0 }
 0x1ab   : > { %v2922_v62 = vpack.c.bf16 %v1088_v40, %v1087_v13  ;;  %v776_v13 = vadd.f32 %v3564_v24, %v3694_v44  ;;  %v1652_v44 = vld [vmem:[%s4527_s5 + $0x98] sm:$0xff] }
 0x1ac   : > { %1316 = vmatmul.mubr.f32.gmra.mrb[24].mxu1 %v3740_v35 }
 0x1ad   : > { %2913 = vmatpush3.bf16.msra.mxu1 %v2912_v5  ;;  %1320 = vmatprep.mubr.f32.mxu1 %v859_v7  ;;  %v1072_v5 = vld [vmem:[%s4525_s3 + $0x308] sm:$0xff] }
 0x1ae   : > { %2915 = vmatprep.subr.bf16.mxu1 %v2914_v3  ;;  %v1089_v3 = vld [vmem:[%s4525_s3 + $0x390] sm:$0xff]  ;;  %v2924_v54 = vpack.c.bf16 %v1072_v5, %v1071_v49  ;;  %v1636_v5 = vld [vmem:[%s4527_s5 + $0x18] sm:$0xff] }
 0x1af   : > { %v2926_v57 = vpack.c.bf16 %v1090_v45, %v1089_v3 }
 0x1b0   : > { %1321 = vmatmul.mubr.f32.gmra.mrb[26].mxu1 %v860_v32 }
 0x1b1   : > { %2917 = vmatpush3.bf16.msra.mxu1 %v2916_v30  ;;  %1390 = vmatprep.mubr.f32.mxu1 %v844_v14  ;;  %v865_v14 = vmax.f32 %v746_v61, 0.0  ;;  %v1091_v30 = vld [vmem:[%s4525_s3 + $0x3a0] sm:$0xff]  ;;  %v1651_v61 = vld [vmem:[%s4527_s5 + $0x90] sm:$0xff] }
 0x1b2   : > { %2919 = vmatprep.subr.bf16.mxu1 %v2918_v34  ;;  %v1092_v34 = vld [vmem:[%s4525_s3 + $0x3a8] sm:$0xff]  ;;  %v2982_v49 = vpack.c.bf16 %v1652_v44, %v1651_v61 }
 0x1b3   : > { %v2930_v40 = vpack.c.bf16 %v1092_v34, %v1091_v30  ;;  %v806_v30 = vadd.f32 %v3564_v24, %v3718_v41 }
 0x1b4   : > { %2983 = vmatprep.subr.bf16.mxu0 %v2982_v49  ;;  %v1084_v49 = vld [vmem:[%s4525_s3 + $0x368] sm:$0xff] }
 0x1b5   : > { %2921 = vmatpush3.bf16.msra.mxu1 %v2920_v63  ;;  %v1076_v63 = vld [vmem:[%s4525_s3 + $0x328] sm:$0xff] }
 0x1b6   : > { %2923 = vmatprep.subr.bf16.mxu1 %v2922_v62  ;;  %v1635_v62 = vld [vmem:[%s4527_s5 + $0x10] sm:$0xff]  ;;  %v2932_v3 = vpack.c.bf16 %v1076_v63, %v1075_v11  ;;  %v1080_v11 = vld [vmem:[%s4525_s3 + $0x348] sm:$0xff] }
 0x1b7   : > { %v2984_v45 = vpack.c.bf16 %v1636_v5, %v1635_v62  ;;  %v1081_v63 = vld [vmem:[%s4525_s3 + $0x350] sm:$0xff]  ;;  %v1083_v62 = vld [vmem:[%s4525_s3 + $0x360] sm:$0xff]  ;;  %v621_v5 = vadd.f32 %v3564_v24, %v3509_v38 }
 0x1b8   : > { %1391 = vmatmul.mubr.f32.vlgmr.msra.gmra.mrb[28].mxu1 %v865_v14  ;;  %v791_v14 = vadd.f32 %v3564_v24, %v3706_v20  ;;  %v1085_v38 = vld [vmem:[%s4525_s3 + $0x370] sm:$0xff] }
 0x1b9   : > { %1395 = vmatprep.mubr.f32.mxu1 %v847_v37  ;;  %2925 = vmatpush3.bf16.msra.mxu1 %v2924_v54  ;;  %v1094_v37 = vld [vmem:[%s4525_s3 + $0x3b8] sm:$0xff]  ;;  %v871_v54 = vmax.f32 %v776_v13, 0.0  ;;  %v821_v13 = vadd.f32 %v3564_v24, %v3730_v18  ;;  %v1100_v18 = vld [vmem:[%s4525_s3 + $0x3e8] sm:$0xff] }
 0x1ba   : > { %2927 = vmatprep.subr.bf16.mxu1 %v2926_v57  ;;  %v2934_v22 = vpack.c.bf16 %v1094_v37, %v1093_v16  ;;  %v1077_v57 = vld [vmem:[%s4525_s3 + $0x330] sm:$0xff]  ;;  %2985 = vmatpush3.bf16.msra.mxu0 %v2984_v45  ;;  %v874_v19 = vmax.f32 %v791_v14, 0.0  ;;  %v1082_v16 = vld [vmem:[%s4525_s3 + $0x358] sm:$0xff]  ;;  %v836_v37 = vadd.f32 %v3564_v24, %v3766_v10  ;;  %v862_v10 = vmax.f32 %v731_v28, 0.0  ;;  %v1107_v28 = vld [vmem:[%s4525_s3 + $0x420] sm:$0xff] }
 0x1bb   : > { %v2936_v20 = vpack.c.bf16 %v1078_v29, %v1077_v57  ;;  %v2944_v61 = vpack.c.bf16 %v1082_v16, %v1081_v63  ;;  %v880_v44 = vmax.f32 %v821_v13, 0.0  ;;  %v2948_v45 = vpack.c.bf16 %v1084_v49, %v1083_v62  ;;  %v1086_v14 = vld [vmem:[%s4525_s3 + $0x378] sm:$0xff]  ;;  %v1653_v29 = vld [vmem:[%s4527_s5 + $0xa0] sm:$0xff] }
 0x1bc   : > { %1396 = vmatmul.mubr.f32.gmra.mrb[30].mxu1 %v868_v43  ;;  %v877_v43 = vmax.f32 %v806_v30, 0.0  ;;  %v636_v57 = vadd.f32 %v3564_v24, %v3521_v47  ;;  %v1104_v47 = vld [vmem:[%s4525_s3 + $0x408] sm:$0xff]  ;;  %v666_v63 = vadd.f32 %v3564_v24, %v3533_v59  ;;  %v696_v49 = vadd.f32 %v3564_v24, %v3545_v9  ;;  %v1111_v9 = vld [vmem:[%s4525_s3 + $0x440] sm:$0xff] }
 0x1bd   : > { %1400 = vmatprep.mubr.f32.mxu1 %v850_v52  ;;  %2929 = vmatpush3.bf16.msra.mxu1 %v2928_v46  ;;  %v1096_v52 = vld [vmem:[%s4525_s3 + $0x3c8] sm:$0xff]  ;;  %v1079_v46 = vld [vmem:[%s4525_s3 + $0x340] sm:$0xff] }
 0x1be   : > { %2931 = vmatprep.subr.bf16.mxu1 %v2930_v40  ;;  %v2938_v34 = vpack.c.bf16 %v1096_v52, %v1095_v39  ;;  %v2940_v41 = vpack.c.bf16 %v1080_v11, %v1079_v46  ;;  %v1654_v39 = vld [vmem:[%s4527_s5 + $0xa8] sm:$0xff]  ;;  %v651_v46 = vadd.f32 %v3564_v24, %v3527_v53  ;;  %v1105_v53 = vld [vmem:[%s4525_s3 + $0x410] sm:$0xff] }
 0x1bf   : > { %v2986_v52 = vpack.c.bf16 %v1654_v39, %v1653_v29  ;;  %v1638_v11 = vld [vmem:[%s4527_s5 + $0x28] sm:$0xff] }
 0x1c0   : > { %1401 = vmatmul.mubr.f32.gmra.mrb[32].mxu1 %v871_v54 }
 0x1c1   : > { %1405 = vmatprep.mubr.f32.mxu1 %v853_v27  ;;  %2933 = vmatpush3.bf16.msra.mxu1 %v2932_v3  ;;  %v1098_v27 = vld [vmem:[%s4525_s3 + $0x3d8] sm:$0xff]  ;;  %v883_v3 = vmax.f32 %v836_v37, 0.0  ;;  %v681_v37 = vadd.f32 %v3564_v24, %v3539_v1 }
 0x1c2   : > { %2935 = vmatprep.subr.bf16.mxu1 %v2934_v22  ;;  %v2942_v40 = vpack.c.bf16 %v1098_v27, %v1097_v58  ;;  %v840_v22 = vmax.f32 %v621_v5, 0.0  ;;  %2987 = vmatprep.subr.bf16.mxu0 %v2986_v52  ;;  %v899_v27 = vrot.slane %v839_v36, 1  ;;  %v902_v36 = vrot.slane %v3630_v31, 1  ;;  %v1110_v1 = vld [vmem:[%s4525_s3 + $0x438] sm:$0xff] }
 0x1c3   : > { %v852_v62 = vmax.f32 %v681_v37, 0.0  ;;  %v1656_v5 = vld [vmem:[%s4527_s5 + $0xb8] sm:$0xff] }
 0x1c4   : > { %1406 = vmatmul.mubr.f32.gmra.mrb[34].mxu1 %v874_v19  ;;  %v1103_v19 = vld [vmem:[%s4525_s3 + $0x400] sm:$0xff]  ;;  %v900_v30 = vrot.slane %v840_v22, 1  ;;  %v1113_v22 = vld [vmem:[%s4525_s3 + $0x450] sm:$0xff] }
 0x1c5   : > { %1410 = vmatprep.mubr.f32.mxu1 %v856_v50  ;;  %2937 = vmatpush3.bf16.msra.mxu1 %v2936_v20  ;;  %v1099_v50 = vld [vmem:[%s4525_s3 + $0x3e0] sm:$0xff]  ;;  %v2952_v20 = vpack.c.bf16 %v1086_v14, %v1085_v38  ;;  %v911_v38 = vrot.slane %v3714_v33, 1  ;;  %v1639_v33 = vld [vmem:[%s4527_s5 + $0x30] sm:$0xff] }
 0x1c6   : > { %2939 = vmatprep.subr.bf16.mxu1 %v2938_v34  ;;  %v2946_v23 = vpack.c.bf16 %v1100_v18, %v1099_v50  ;;  %v843_v34 = vmax.f32 %v636_v57, 0.0  ;;  %v901_v26 = vsel %vm898_vm5, %v899_v27, %v900_v30  ;;  %v1108_v50 = vld [vmem:[%s4525_s3 + $0x428] sm:$0xff]  ;;  %v849_v18 = vmax.f32 %v666_v63, 0.0  ;;  %v1114_v57 = vld [vmem:[%s4525_s3 + $0x458] sm:$0xff] }
 0x1c7   : > { %v1116_v30 = vld [vmem:[%s4525_s3 + $0x468] sm:$0xff] }
 0x1c8   : > { %1411 = vmatmul.mubr.f32.gmra.mrb[36].mxu1 %v877_v43  ;;  %v1106_v43 = vld [vmem:[%s4525_s3 + $0x418] sm:$0xff]  ;;  %v903_v13 = vrot.slane %v843_v34, 1 }
 0x1c9   : > { %1415 = vmatprep.mubr.f32.mxu1 %v859_v7  ;;  %2941 = vmatpush3.bf16.msra.mxu1 %v2940_v41  ;;  %v1102_v7 = vld [vmem:[%s4525_s3 + $0x3f8] sm:$0xff]  ;;  %v2955_v41 = vpack.c.bf16 %v1104_v47, %v1103_v19  ;;  %v2958_v16 = vpack.c.bf16 %v1106_v43, %v1105_v53  ;;  %v2970_v19 = vpack.c.bf16 %v1114_v57, %v1113_v22  ;;  %v1115_v47 = vld [vmem:[%s4525_s3 + $0x460] sm:$0xff]  ;;  %v1642_v43 = vld [vmem:[%s4527_s5 + $0x48] sm:$0xff] }
 0x1ca   : > { %2943 = vmatprep.subr.bf16.mxu1 %v2942_v40  ;;  %v2950_v54 = vpack.c.bf16 %v1102_v7, %v1101_v60  ;;  %v846_v40 = vmax.f32 %v651_v46, 0.0  ;;  %v4091_v31 = vsel %vm898_vm5, %v902_v36, %v903_v13  ;;  %v908_v60 = vrot.slane %v3702_v8, 1  ;;  %v1668_v22 = vld [vmem:[%s4527_s5 + $0x118] sm:$0xff] }
 0x1cb   : > { %v711_v8 = vadd.f32 %v3564_v24, %v3551_v15  ;;  %v971_v36 = vrot.slane %v860_v32, 1  ;;  %v1644_v32 = vld [vmem:[%s4527_s5 + $0x58] sm:$0xff] }
 0x1cc   : > { %1416 = vmatmul.mubr.f32.gmra.mrb[38].mxu1 %v880_v44  ;;  %v906_v59 = vrot.slane %v846_v40, 1  ;;  %v1109_v44 = vld [vmem:[%s4525_s3 + $0x430] sm:$0xff]  ;;  %v726_v40 = vadd.f32 %v3564_v24, %v3557_v21 }
 0x1cd   : > { %1420 = vmatprep.mubr.f32.mxu1 %v862_v10  ;;  %2945 = vmatpush3.bf16.msra.mxu1 %v2944_v61  ;;  %v2961_v61 = vpack.c.bf16 %v1108_v50, %v1107_v28  ;;  %v2964_v7 = vpack.c.bf16 %v1110_v1, %v1109_v44  ;;  %v858_v29 = vmax.f32 %v711_v8, 0.0  ;;  %v1659_v24 = vld [vmem:[%s4527_s5 + $0xd0] sm:$0xff]  ;;  %v1645_v1 = vld [vmem:[%s4527_s5 + $0x60] sm:$0xff] }
 0x1ce   : > { %2947 = vmatprep.subr.bf16.mxu1 %v2946_v23  ;;  %v909_v23 = vrot.slane %v849_v18, 1  ;;  %v861_v63 = vmax.f32 %v726_v40, 0.0  ;;  %v1643_v28 = vld [vmem:[%s4527_s5 + $0x50] sm:$0xff]  ;;  %v1673_v40 = vld [vmem:[%s4527_s5 + $0x140] sm:$0xff] }
 0x1cf   : > { %v918_v34 = vrot.slane %v858_v29, 1  ;;  %v3000_v50 = vpack.c.bf16 %v1644_v32, %v1643_v28  ;;  %v1683_v8 = vld [vmem:[%s4527_s5 + $0x190] sm:$0xff]  ;;  %v1664_v29 = vld [vmem:[%s4527_s5 + $0xf8] sm:$0xff] }
 0x1d0   : > { %1421 = vmatmul.mubr.f32.gmra.mrb[40].mxu1 %v883_v3  ;;  %v1112_v3 = vld [vmem:[%s4525_s3 + $0x448] sm:$0xff]  ;;  %v1676_v28 = vld [vmem:[%s4527_s5 + $0x158] sm:$0xff] }
 0x1d1   : > { %2949 = vmatpush3.bf16.msra.mxu1 %v2948_v45  ;;  %1490 = vmatprep.mubr.f32.mxu1 %v3613_v12  ;;  %v1637_v12 = vld [vmem:[%s4527_s5 + $0x20] sm:$0xff]  ;;  %v912_v45 = vrot.slane %v852_v62, 1  ;;  %v2967_v14 = vpack.c.bf16 %v1112_v3, %v1111_v9 }
 0x1d2   : > { %2951 = vmatprep.subr.bf16.mxu1 %v2950_v54  ;;  %v2988_v58 = vpack.c.bf16 %v1638_v11, %v1637_v12  ;;  %v855_v54 = vmax.f32 %v696_v49, 0.0  ;;  %v1117_v12 = vld [vmem:[%s4525_s3 + $0x470] sm:$0xff]  ;;  %v1118_v11 = vld [vmem:[%s4525_s3 + $0x478] sm:$0xff]  ;;  %v1665_v3 = vld [vmem:[%s4527_s5 + $0x100] sm:$0xff] }
 0x1d3   : > { %v913_v39 = vsel %vm898_vm5, %v911_v38, %v912_v45  ;;  %v2976_v27 = vpack.c.bf16 %v1118_v11, %v1117_v12  ;;  %v1666_v45 = vld [vmem:[%s4527_s5 + $0x108] sm:$0xff]  ;;  %v1687_v11 = vld [vmem:[%s4527_s5 + $0x1b0] sm:$0xff] }
 0x1d4   : > { %2989 = vmatpush3.bf16.msra.mxu0 %v2988_v58  ;;  %v915_v15 = vrot.slane %v855_v54, 1  ;;  %v3012_v54 = vpack.c.bf16 %v1666_v45, %v1665_v3 }
 0x1d5   : > { %2953 = vmatpush3.bf16.msra.mxu1 %v2952_v20  ;;  %v914_v20 = vrot.slane %v3726_v0, 1  ;;  %v917_v0 = vrot.slane %v3740_v35, 1  ;;  %v1657_v35 = vld [vmem:[%s4527_s5 + $0xc0] sm:$0xff] }
 0x1d6   : > { %2954 = vmatprep.subr.bf16.mxu1 %v3151_v2 }
 0x1d7   : > { %v916_v46 = vsel %vm898_vm5, %v914_v20, %v915_v15  ;;  %v919_v58 = vsel %vm898_vm5, %v917_v0, %v918_v34  ;;  %v1663_v15 = vld [vmem:[%s4527_s5 + $0xf0] sm:$0xff]  ;;  %v1686_v20 = vld [vmem:[%s4527_s5 + $0x1a8] sm:$0xff]  ;;  %v1669_v34 = vld [vmem:[%s4527_s5 + $0x120] sm:$0xff] }
 0x1d8   : > { %1491 = vmatmul.mubr.f32.vlgmr.msra.gmra.mrb[42].mxu1 %v901_v26  ;;  %v972_v26 = vrot.slane %v861_v63, 1  ;;  %v1674_v63 = vld [vmem:[%s4527_s5 + $0x148] sm:$0xff] }
 0x1d9   : > { %1495 = vmatprep.mubr.f32.mxu1 %v3661_v6  ;;  %2956 = vmatpush3.bf16.msra.mxu1 %v2955_v41  ;;  %v905_v6 = vrot.slane %v3678_v42, 1  ;;  %v1641_v41 = vld [vmem:[%s4527_s5 + $0x40] sm:$0xff] }
 0x1da   : > { %2957 = vmatprep.subr.bf16.mxu1 %v3151_v2  ;;  %v2996_v13 = vpack.c.bf16 %v1642_v43, %v1641_v41  ;;  %v973_v21 = vsel %vm898_vm5, %v971_v36, %v972_v26  ;;  %v1690_v43 = vld [vmem:[%s4527_s5 + $0x1c8] sm:$0xff]  ;;  %v3028_v26 = vpack.c.bf16 %v1674_v63, %v1673_v40  ;;  %v1691_v36 = vld [vmem:[%s4527_s5 + $0x1d0] sm:$0xff] }
 0x1db   : > { %v907_v42 = vsel %vm898_vm5, %v905_v6, %v906_v59  ;;  %v1662_v6 = vld [vmem:[%s4527_s5 + $0xe8] sm:$0xff] }
 0x1dc   : > { %1496 = vmatmul.mubr.f32.gmra.mrb[44].mxu1 %v4091_v31 }
 0x1dd   : > { %1500 = vmatprep.mubr.f32.mxu1 %v3697_v56  ;;  %2959 = vmatpush3.bf16.msra.mxu1 %v2958_v16  ;;  %v1655_v56 = vld [vmem:[%s4527_s5 + $0xb0] sm:$0xff]  ;;  %v1660_v16 = vld [vmem:[%s4527_s5 + $0xd8] sm:$0xff] }
 0x1de   : > { %2960 = vmatprep.subr.bf16.mxu1 %v3151_v2  ;;  %v2990_v10 = vpack.c.bf16 %v1656_v5, %v1655_v56  ;;  %v2998_v17 = vpack.c.bf16 %v1660_v16, %v1659_v24  ;;  %v1675_v16 = vld [vmem:[%s4527_s5 + $0x150] sm:$0xff] }
 0x1df   : > { %v3032_v32 = vpack.c.bf16 %v1676_v28, %v1675_v16 }
 0x1e0   : > { %1501 = vmatmul.mubr.f32.gmra.mrb[46].mxu1 %v907_v42  ;;  %2991 = vmatprep.subr.bf16.mxu0 %v2990_v10 }
 0x1e1   : > { %1505 = vmatprep.mubr.f32.mxu1 %v3709_v51  ;;  %2962 = vmatpush3.bf16.msra.mxu1 %v2961_v61  ;;  %v910_v51 = vsel %vm898_vm5, %v908_v60, %v909_v23  ;;  %v1646_v23 = vld [vmem:[%s4527_s5 + $0x68] sm:$0xff]  ;;  %v1681_v60 = vld [vmem:[%s4527_s5 + $0x180] sm:$0xff] }
 0x1e2   : > { %2963 = vmatprep.subr.bf16.mxu1 %v3151_v2  ;;  %v3004_v49 = vpack.c.bf16 %v1646_v23, %v1645_v1  ;;  %v1677_v1 = vld [vmem:[%s4527_s5 + $0x160] sm:$0xff]  ;;  %v1678_v23 = vld [vmem:[%s4527_s5 + $0x168] sm:$0xff] }
 0x1e4   : > { %1506 = vmatmul.mubr.f32.gmra.mrb[48].mxu1 %v910_v51 }
 0x1e5   : > { %1510 = vmatprep.mubr.f32.mxu1 %v3721_v48  ;;  %2965 = vmatpush3.bf16.msra.mxu1 %v2964_v7  ;;  %v1640_v48 = vld [vmem:[%s4527_s5 + $0x38] sm:$0xff]  ;;  %v1682_v7 = vld [vmem:[%s4527_s5 + $0x188] sm:$0xff] }
 0x1e6   : > { %2966 = vmatprep.subr.bf16.mxu1 %v3151_v2  ;;  %v2992_v52 = vpack.c.bf16 %v1640_v48, %v1639_v33  ;;  %v3010_v9 = vpack.c.bf16 %v1682_v7, %v1681_v60  ;;  %v3006_v33 = vpack.c.bf16 %v1664_v29, %v1663_v15  ;;  %v1648_v48 = vld [vmem:[%s4527_s5 + $0x78] sm:$0xff]  ;;  %v1679_v7 = vld [vmem:[%s4527_s5 + $0x170] sm:$0xff] }
 0x1e8   : > { %1511 = vmatmul.mubr.f32.gmra.mrb[50].mxu1 %v913_v39  ;;  %2993 = vmatpush3.bf16.msra.mxu0 %v2992_v52  ;;  %v1685_v52 = vld [vmem:[%s4527_s5 + $0x1a0] sm:$0xff] }
 0x1e9   : > { %1515 = vmatprep.mubr.f32.mxu1 %v3733_v25  ;;  %2968 = vmatpush3.bf16.msra.mxu1 %v2967_v14  ;;  %v2973_v25 = vpack.c.bf16 %v1116_v30, %v1115_v47  ;;  %v1667_v14 = vld [vmem:[%s4527_s5 + $0x110] sm:$0xff]  ;;  %v3018_v30 = vpack.c.bf16 %v1686_v20, %v1685_v52 }
 0x1ea   : > { %2969 = vmatprep.subr.bf16.mxu1 %v3151_v2  ;;  %v3016_v57 = vpack.c.bf16 %v1668_v22, %v1667_v14  ;;  %v2187_v22 = vld [vmem:[%s4526_s4] ss:$0 sm:$0xff] }
 0x1ec   : > { %1516 = vmatmul.mubr.f32.gmra.mrb[52].mxu1 %v916_v46 }
 0x1ed   : > { %1520 = vmatprep.mubr.f32.mxu1 %v3783_v55  ;;  %2971 = vmatpush3.bf16.msra.mxu1 %v2970_v19  ;;  %v1658_v55 = vld [vmem:[%s4527_s5 + $0xc8] sm:$0xff] }
 0x1ee   : > { %2972 = vmatprep.subr.bf16.mxu1 %v3151_v2  ;;  %v2994_v53 = vpack.c.bf16 %v1658_v55, %v1657_v35  ;;  %v1672_v55 = vld [vmem:[%s4527_s5 + $0x138] sm:$0xff] }
 0x1f0   : > { %1521 = vmatmul.mubr.f32.gmra.mrb[54].mxu1 %v919_v58  ;;  %2995 = vmatprep.subr.bf16.mxu0 %v2994_v53  ;;  %v1689_v53 = vld [vmem:[%s4527_s5 + $0x1c0] sm:$0xff] }
 0x1f1   : > { %2974 = vmatpush3.bf16.msra.mxu1 %v2973_v25  ;;  %2766 = vmatprep.mubr.msk.f32.mxu1 %vm3153_vm3, %v3154_v4 }
 0x1f2   : > { %2975 = vmatprep.subr.bf16.mxu1 %v3151_v2  ;;  %2997 = vmatpush3.bf16.msra.mxu0 %v2996_v13  ;;  %v3026_v13 = vpack.c.bf16 %v1690_v43, %v1689_v53 }
 0x1f3   : > { %2999 = vmatprep.subr.bf16.mxu0 %v2998_v17 }
 0x1f5   : > { %2977 = vmatpush3.bf16.msra.mxu1 %v2976_v27  ;;  %v1671_v27 = vld [vmem:[%s4527_s5 + $0x130] sm:$0xff] }
 0x1f6   : > { %3001 = vmatpush3.bf16.msra.mxu0 %v3000_v50  ;;  %3011 = vmatprep.subr.bf16.mxu1 %v3010_v9  ;;  %v3024_v41 = vpack.c.bf16 %v1672_v55, %v1671_v27  ;;  %v1680_v9 = vld [vmem:[%s4527_s5 + $0x178] sm:$0xff] }
 0x1f7   : > { %v3040_v3 = vpack.c.bf16 %v1680_v9, %v1679_v7 }
 0x1f8   : > { %2767 = vmatmul.mubr.f32.vlgmr.msra.gmra.mrb[56].mxu1 %v4091_v31  ;;  %v1661_v31 = vld [vmem:[%s4527_s5 + $0xe0] sm:$0xff] }
 0x1f9   : > { %2769 = vmatprep.mubr.msk.f32.mxu1 %vm3153_vm3, %v3154_v4  ;;  %v3002_v61 = vpack.c.bf16 %v1662_v6, %v1661_v31  ;;  %3013 = vmatpush3.bf16.msra.mxu1 %v3012_v54  ;;  %v1694_v31 = vld [vmem:[%s4527_s5 + $0x1e8] sm:$0xff]  ;;  %v1713_v6 = vld [vmem:[%s4527_s5 + $0x280] sm:$0xff] }
 0x1fb   : > { %3003 = vmatprep.subr.bf16.mxu0 %v3002_v61 }
 0x1fc   : > { %2770 = vmatmul.mubr.f32.gmra.mrb[58].mxu1 %v907_v42  ;;  %3005 = vmatpush3.bf16.msra.mxu0 %v3004_v49  ;;  %v3036_v49 = vpack.c.bf16 %v1678_v23, %v1677_v1 }
 0x1fd   : > { %2772 = vmatprep.mubr.msk.f32.mxu1 %vm3153_vm3, %v3154_v4  ;;  %3007 = vmatprep.subr.bf16.mxu0 %v3006_v33 }
 0x200   : > { %2773 = vmatmul.mubr.f32.gmra.mrb[60].mxu1 %v910_v51  ;;  %v1684_v51 = vld [vmem:[%s4527_s5 + $0x198] sm:$0xff] }
 0x201   : > { %2775 = vmatprep.mubr.msk.f32.mxu1 %vm3153_vm3, %v3154_v4  ;;  %v3014_v38 = vpack.c.bf16 %v1684_v51, %v1683_v8 }
 0x203   : > { %3015 = vmatprep.subr.bf16.mxu1 %v3014_v38 }
 0x204   : > { %2776 = vmatmul.mubr.f32.gmra.mrb[62].mxu1 %v913_v39  ;;  %v1647_v39 = vld [vmem:[%s4527_s5 + $0x70] sm:$0xff] }
 0x205   : > { %2778 = vmatprep.mubr.msk.f32.mxu1 %vm3153_vm3, %v3154_v4  ;;  %3017 = vmatpush3.bf16.msra.mxu1 %v3016_v57  ;;  %v3008_v47 = vpack.c.bf16 %v1648_v48, %v1647_v39 }
 0x206   : > { %3019 = vmatprep.subr.bf16.mxu1 %v3018_v30 }
 0x207   : > { %3009 = vmatpush3.bf16.msra.mxu0 %v3008_v47 }
 0x208   : > { %2779 = vmatmul.mubr.f32.gmra.mrb[64].mxu1 %v916_v46  ;;  %v1670_v46 = vld [vmem:[%s4527_s5 + $0x128] sm:$0xff] }
 0x209   : > { %2781 = vmatprep.mubr.msk.f32.mxu1 %vm3153_vm3, %v3154_v4  ;;  %v3020_v25 = vpack.c.bf16 %v1670_v46, %v1669_v34 }
 0x20b   : > { %3021 = vmatpush3.bf16.msra.mxu1 %v3020_v25 }
 0x20c   : > { %2782 = vmatmul.mubr.f32.gmra.mrb[66].mxu1 %v919_v58  ;;  %v1688_v58 = vld [vmem:[%s4527_s5 + $0x1b8] sm:$0xff] }
 0x20d   : > { %2784 = vmatprep.mubr.msk.f32.mxu1 %vm3153_vm3, %v3154_v4  ;;  %v3022_v35 = vpack.c.bf16 %v1688_v58, %v1687_v11 }
 0x20f   : > { %3023 = vmatprep.subr.bf16.mxu1 %v3022_v35 }
 0x210   : > { %2785 = vmatmul.mubr.f32.gmra.mrb[68].mxu1 %v973_v21  ;;  %v1692_v21 = vld [vmem:[%s4527_s5 + $0x1d8] sm:$0xff] }
 0x211   : > { %3025 = vmatpush3.bf16.msra.mxu1 %v3024_v41  ;;  %v3030_v24 = vpack.c.bf16 %v1692_v21, %v1691_v36 }
 0x212   : > { %3027 = vmatprep.subr.bf16.mxu1 %v3026_v13 }
 0x215   : > { %3029 = vmatpush3.bf16.msra.mxu1 %v3028_v26 }
 0x216   : > { %3031 = vmatprep.subr.bf16.mxu1 %v3030_v24 }
 0x219   : > { %3033 = vmatpush3.bf16.msra.mxu1 %v3032_v32 }
 0x21f   : > { %v2270_v59 = vpop.f32.mrb[0].mxu1 }
 0x220   : > { %v2271_v18 = vpop.f32.mrb[1].mxu1 }
 0x221   : > { %v4205_v37 = vadd.f32 %v2271_v18, %v2270_v59  ;;  %v1693_v18 = vld [vmem:[%s4527_s5 + $0x1e0] sm:$0xff] }
 0x222   : > { %v3034_v61 = vpack.c.bf16 %v1694_v31, %v1693_v18 }
 0x223   : > { %v1193_v29 = vadd.f32 %v4205_v37, %v2187_v22 }
 0x224   : > { %3035 = vmatprep.subr.bf16.mxu1 %v3034_v61 }
 0x225   : > { %3037 = vmatpush3.bf16.msra.mxu1 %v3036_v49 }
 0x22b   : > { %v2273_v44 = vpop.f32.mrb[2].mxu1 }
 0x22c   : > { %v2274_v62 = vpop.f32.mrb[3].mxu1 }
 0x22d   : > { %v4219_v42 = vadd.f32 %v2274_v62, %v2273_v44  ;;  %v1714_v44 = vld [vmem:[%s4527_s5 + $0x288] sm:$0xff] }
 0x22e   : > { %v3042_v62 = vpack.c.bf16 %v1714_v44, %v1713_v6 }
 0x22f   : > { %v1198_v20 = vadd.f32 %v4219_v42, %v2187_v22 }
 0x230   : > { %3043 = vmatprep.subr.bf16.mxu0 %v3042_v62 }
 0x237   : > { %v2276_v56 = vpop.f32.mrb[4].mxu1 }
 0x238   : > { %v2277_v5 = vpop.f32.mrb[5].mxu1 }
 0x239   : > { %v4221_v10 = vadd.f32 %v2277_v5, %v2276_v56  ;;  %v1695_v56 = vld [vmem:[%s4527_s5 + $0x1f0] sm:$0xff]  ;;  %v1696_v5 = vld [vmem:[%s4527_s5 + $0x1f8] sm:$0xff] }
 0x23a   : > { %v3038_v60 = vpack.c.bf16 %v1696_v5, %v1695_v56 }
 0x23b   : > { %v1203_v46 = vadd.f32 %v4221_v10, %v2187_v22 }
 0x23c   : > { %3039 = vmatprep.subr.bf16.mxu1 %v3038_v60 }
 0x23d   : > { %3041 = vmatpush3.bf16.msra.mxu1 %v3040_v3 }
 0x23e   : > { %3074 = vmatprep.subr.bf16.mxu1 %v3151_v2 }
 0x243   : > { %v2279_v19 = vpop.f32.mrb[6].mxu1 }
 0x244   : > { %v2280_v0 = vpop.f32.mrb[7].mxu1 }
 0x245   : > { %v4271_v12 = vadd.f32 %v2280_v0, %v2279_v19 }
 0x247   : > { %v1208_v27 = vadd.f32 %v4271_v12, %v2187_v22 }
 0x24f   : > { %v2282_v17 = vpop.f32.mrb[8].mxu1 }
 0x250   : > { %v2283_v50 = vpop.f32.mrb[9].mxu1 }
 0x251   : > { %v2284_v59 = vadd.f32 %v2283_v50, %v2282_v17 }
 0x253   : > { %v1213_v53 = vadd.f32 %v2284_v59, %v2187_v22 }
 0x25b   : > { %v2285_v45 = vpop.f32.mrb[10].mxu1 }
 0x25c   : > { %v2286_v54 = vpop.f32.mrb[11].mxu1 }
 0x25d   : > { %v2287_v8 = vadd.f32 %v2286_v54, %v2285_v45 }
 0x25f   : > { %v1218_v63 = vadd.f32 %v2287_v8, %v2187_v22 }
 0x267   : > { %v2288_v51 = vpop.f32.mrb[12].mxu1 }
 0x268   : > { %v2289_v38 = vpop.f32.mrb[13].mxu1 }
 0x269   : > { %v2290_v14 = vadd.f32 %v2289_v38, %v2288_v51 }
 0x26b   : > { %v2323_v57 = vpop.f32.mrb[14].mxu1  ;;  %v1223_v24 = vadd.f32 %v2290_v14, %v2187_v22 }
 0x26c   : > { %v2324_v15 = vpop.f32.mrb[15].mxu1 }
 0x26d   : > { %v2325_v39 = vadd.f32 %v2324_v15, %v2323_v57 }
 0x26f   : > { %v1293_v33 = vadd.f32 %v2325_v39, %v1193_v29  ;;  %v2326_v48 = vpop.f32.mrb[16].mxu1 }
 0x270   : > { %v2327_v52 = vpop.f32.mrb[17].mxu1 }
 0x271   : > { %v2328_v19 = vadd.f32 %v2327_v52, %v2326_v48 }
 0x273   : > { %v1298_v47 = vadd.f32 %v2328_v19, %v1198_v20  ;;  %v2329_v30 = vpop.f32.mrb[18].mxu1 }
 0x274   : > { %v2330_v34 = vpop.f32.mrb[19].mxu1 }
 0x275   : > { %v2331_v0 = vadd.f32 %v2330_v34, %v2329_v30 }
 0x277   : > { %v1303_v25 = vadd.f32 %v2331_v0, %v1203_v46  ;;  %v2332_v11 = vpop.f32.mrb[20].mxu1 }
 0x278   : > { %v2333_v58 = vpop.f32.mrb[21].mxu1 }
 0x279   : > { %v2334_v35 = vadd.f32 %v2333_v58, %v2332_v11 }
 0x27b   : > { %v1308_v37 = vadd.f32 %v2334_v35, %v1208_v27  ;;  %v2335_v55 = vpop.f32.mrb[22].mxu1 }
 0x27c   : > { %v2336_v41 = vpop.f32.mrb[23].mxu1 }
 0x27d   : > { %v2337_v43 = vadd.f32 %v2336_v41, %v2335_v55 }
 0x27f   : > { %v1313_v13 = vadd.f32 %v2337_v43, %v1213_v53  ;;  %v2338_v42 = vpop.f32.mrb[24].mxu1 }
 0x280   : > { %v2339_v40 = vpop.f32.mrb[25].mxu1 }
 0x281   : > { %v2340_v26 = vadd.f32 %v2339_v40, %v2338_v42 }
 0x283   : > { %v1318_v36 = vadd.f32 %v2340_v26, %v1218_v63  ;;  %v2341_v21 = vpop.f32.mrb[26].mxu1 }
 0x284   : > { %v2342_v10 = vpop.f32.mrb[27].mxu1 }
 0x285   : > { %v2343_v16 = vadd.f32 %v2342_v10, %v2341_v21 }
 0x287   : > { %v1323_v28 = vadd.f32 %v2343_v16, %v1223_v24  ;;  %v1697_v16 = vld [vmem:[%s4527_s5 + $0x200] sm:$0xff] }
 0x28b   : > { %v2376_v17 = vpop.f32.mrb[28].mxu1 }
 0x28c   : > { %v2377_v32 = vpop.f32.mrb[29].mxu1 }
 0x28d   : > { %v2378_v12 = vadd.f32 %v2377_v32, %v2376_v17 }
 0x28f   : > { %v1393_v50 = vadd.f32 %v2378_v12, %v1293_v33  ;;  %v2379_v18 = vpop.f32.mrb[30].mxu1  ;;  %v1715_v12 = vld [vmem:[%s4527_s5 + $0x290] sm:$0xff] }
 0x290   : > { %v2380_v31 = vpop.f32.mrb[31].mxu1 }
 0x291   : > { %v2381_v6 = vadd.f32 %v2380_v31, %v2379_v18 }
 0x293   : > { %v1398_v59 = vadd.f32 %v2381_v6, %v1298_v47  ;;  %v2382_v61 = vpop.f32.mrb[32].mxu1 }
 0x294   : > { %v2383_v44 = vpop.f32.mrb[33].mxu1 }
 0x295   : > { %v2384_v1 = vadd.f32 %v2383_v44, %v2382_v61  ;;  %v1699_v44 = vld [vmem:[%s4527_s5 + $0x210] sm:$0xff] }
 0x297   : > { %v1403_v23 = vadd.f32 %v2384_v1, %v1303_v25  ;;  %v2385_v62 = vpop.f32.mrb[34].mxu1  ;;  %v1700_v1 = vld [vmem:[%s4527_s5 + $0x218] sm:$0xff] }
 0x298   : > { %v2386_v49 = vpop.f32.mrb[35].mxu1 }
 0x299   : > { %v2387_v56 = vadd.f32 %v2386_v49, %v2385_v62  ;;  %v1717_v49 = vld [vmem:[%s4527_s5 + $0x2a0] sm:$0xff] }
 0x29b   : > { %v1408_v5 = vadd.f32 %v2387_v56, %v1308_v37  ;;  %v2388_v60 = vpop.f32.mrb[36].mxu1  ;;  %v1718_v56 = vld [vmem:[%s4527_s5 + $0x2a8] sm:$0xff] }
 0x29c   : > { %v2389_v7 = vpop.f32.mrb[37].mxu1 }
 0x29d   : > { %v2390_v9 = vadd.f32 %v2389_v7, %v2388_v60  ;;  %v1701_v60 = vld [vmem:[%s4527_s5 + $0x220] sm:$0xff] }
 0x29f   : > { %v1413_v3 = vadd.f32 %v2390_v9, %v1313_v13  ;;  %v2391_v45 = vpop.f32.mrb[38].mxu1  ;;  %v3050_v9 = vpack.c.bf16 %v1718_v56, %v1717_v49  ;;  %v1711_v49 = vld [vmem:[%s4527_s5 + $0x270] sm:$0xff] }
 0x2a0   : > { %v2392_v54 = vpop.f32.mrb[39].mxu1 }
 0x2a1   : > { %v2393_v8 = vadd.f32 %v2392_v54, %v2391_v45  ;;  %v1729_v45 = vld [vmem:[%s4527_s5 + $0x300] sm:$0xff]  ;;  %v1730_v54 = vld [vmem:[%s4527_s5 + $0x308] sm:$0xff] }
 0x2a3   : > { %v1418_v51 = vadd.f32 %v2393_v8, %v1318_v36  ;;  %v2394_v38 = vpop.f32.mrb[40].mxu1 }
 0x2a4   : > { %v2395_v14 = vpop.f32.mrb[41].mxu1 }
 0x2a5   : > { %v2396_v22 = vadd.f32 %v2395_v14, %v2394_v38  ;;  %v1719_v38 = vld [vmem:[%s4527_s5 + $0x2b0] sm:$0xff]  ;;  %v1720_v14 = vld [vmem:[%s4527_s5 + $0x2b8] sm:$0xff] }
 0x2a7   : > { %v1423_v57 = vadd.f32 %v2396_v22, %v1323_v28  ;;  %v1698_v28 = vld [vmem:[%s4527_s5 + $0x208] sm:$0xff] }
 0x2a8   : > { %v3044_v31 = vpack.c.bf16 %v1698_v28, %v1697_v16  ;;  %v1736_v16 = vld [vmem:[%s4527_s5 + $0x338] sm:$0xff] }
 0x2ab   : > { %v2429_v15 = vpop.f32.mrb[42].mxu1 }
 0x2ac   : > { %v2430_v29 = vpop.f32.mrb[43].mxu1 }
 0x2ad   : > { %v2431_v39 = vadd.f32 %v2430_v29, %v2429_v15  ;;  %v3075_v15 = vpack.c.bf16 %v1730_v54, %v1729_v45  ;;  %v1703_v29 = vld [vmem:[%s4527_s5 + $0x230] sm:$0xff]  ;;  %v1741_v45 = vld [vmem:[%s4527_s5 + $0x360] sm:$0xff]  ;;  %v1742_v54 = vld [vmem:[%s4527_s5 + $0x368] sm:$0xff] }
 0x2af   : > { %v2432_v33 = vpop.f32.mrb[44].mxu1  ;;  %v1493_v48 = vadd.f32 %v2431_v39, %v1393_v50  ;;  %v1716_v50 = vld [vmem:[%s4527_s5 + $0x298] sm:$0xff] }
 0x2b0   : > { %v2433_v52 = vpop.f32.mrb[45].mxu1  ;;  %v3046_v61 = vpack.c.bf16 %v1716_v50, %v1715_v12  ;;  %v1726_v12 = vld [vmem:[%s4527_s5 + $0x2e8] sm:$0xff] }
 0x2b1   : > { %v2434_v20 = vadd.f32 %v2433_v52, %v2432_v33  ;;  %v1704_v52 = vld [vmem:[%s4527_s5 + $0x238] sm:$0xff] }
 0x2b3   : > { %v2435_v19 = vpop.f32.mrb[46].mxu1  ;;  %v1498_v47 = vadd.f32 %v2434_v20, %v1398_v59  ;;  %v1731_v20 = vld [vmem:[%s4527_s5 + $0x310] sm:$0xff] }
 0x2b4   : > { %v2436_v30 = vpop.f32.mrb[47].mxu1 }
 0x2b5   : > { %v2437_v34 = vadd.f32 %v2436_v30, %v2435_v19  ;;  %v1732_v19 = vld [vmem:[%s4527_s5 + $0x318] sm:$0xff] }
 0x2b7   : > { %v2438_v46 = vpop.f32.mrb[48].mxu1  ;;  %v1503_v0 = vadd.f32 %v2437_v34, %v1403_v23  ;;  %v1721_v34 = vld [vmem:[%s4527_s5 + $0x2c0] sm:$0xff] }
 0x2b8   : > { %v2439_v25 = vpop.f32.mrb[49].mxu1 }
 0x2b9   : > { %v2440_v11 = vadd.f32 %v2439_v25, %v2438_v46  ;;  %v1722_v46 = vld [vmem:[%s4527_s5 + $0x2c8] sm:$0xff]  ;;  %v3078_v25 = vpack.c.bf16 %v1732_v19, %v1731_v20 }
 0x2bb   : > { %v2441_v58 = vpop.f32.mrb[50].mxu1  ;;  %v1508_v27 = vadd.f32 %v2440_v11, %v1408_v5  ;;  %v3048_v5 = vpack.c.bf16 %v1700_v1, %v1699_v44  ;;  %v1705_v11 = vld [vmem:[%s4527_s5 + $0x240] sm:$0xff]  ;;  %v1727_v44 = vld [vmem:[%s4527_s5 + $0x2f0] sm:$0xff]  ;;  %v1728_v1 = vld [vmem:[%s4527_s5 + $0x2f8] sm:$0xff] }
 0x2bc   : > { %v2442_v35 = vpop.f32.mrb[51].mxu1  ;;  %v3070_v56 = vpack.c.bf16 %v1728_v1, %v1727_v44 }
 0x2bd   : > { %v2443_v37 = vadd.f32 %v2442_v35, %v2441_v58  ;;  %v1706_v35 = vld [vmem:[%s4527_s5 + $0x248] sm:$0xff] }
 0x2bf   : > { %v2444_v55 = vpop.f32.mrb[52].mxu1  ;;  %v1513_v41 = vadd.f32 %v2443_v37, %v1413_v3  ;;  %v1702_v3 = vld [vmem:[%s4527_s5 + $0x228] sm:$0xff]  ;;  %v1733_v37 = vld [vmem:[%s4527_s5 + $0x320] sm:$0xff] }
 0x2c0   : > { %v2445_v53 = vpop.f32.mrb[53].mxu1 }
 0x2c1   : > { %v2446_v43 = vadd.f32 %v2445_v53, %v2444_v55  ;;  %v1734_v55 = vld [vmem:[%s4527_s5 + $0x328] sm:$0xff] }
 0x2c3   : > { %v2447_v13 = vpop.f32.mrb[54].mxu1  ;;  %v4347_v42 = vadd.f32 %v2446_v43, %v1418_v51  ;;  %v1723_v43 = vld [vmem:[%s4527_s5 + $0x2d0] sm:$0xff] }
 0x2c4   : > { %v2448_v40 = vpop.f32.mrb[55].mxu1 }
 0x2c5   : > { %v2449_v63 = vadd.f32 %v2448_v40, %v2447_v13  ;;  %v1724_v13 = vld [vmem:[%s4527_s5 + $0x2d8] sm:$0xff] }
 0x2c7   : > { %v4349_v26 = vadd.f32 %v2449_v63, %v1423_v57  ;;  %v3052_v57 = vpack.c.bf16 %v1702_v3, %v1701_v60  ;;  %v3060_v63 = vpack.c.bf16 %v1706_v35, %v1705_v11  ;;  %v1739_v60 = vld [vmem:[%s4527_s5 + $0x350] sm:$0xff] }
 0x2cb   : > { %v1592_v36 = vpop.f32.mrb[56].mxu1 }
 0x2cc   : > { %v1593_v21 = vadd.f32 %v1592_v36, %v1493_v48  ;;  %v2768_v10 = vpop.f32.mrb[57].mxu1  ;;  %v3054_v48 = vpack.c.bf16 %v1720_v14, %v1719_v38  ;;  %v3081_v36 = vpack.c.bf16 %v1734_v55, %v1733_v37  ;;  %v1743_v38 = vld [vmem:[%s4527_s5 + $0x370] sm:$0xff]  ;;  %v1744_v14 = vld [vmem:[%s4527_s5 + $0x378] sm:$0xff] }
 0x2cd   : > { %v3062_v10 = vpack.c.bf16 %v1724_v13, %v1723_v43 }
 0x2ce   : > { %v1626_v6 = vmax.f32 %v1593_v21, 0.0 }
 0x2cf   : > { %v1597_v24 = vpop.f32.mrb[58].mxu1 }
 0x2d0   : > { %v1598_v17 = vadd.f32 %v1597_v24, %v1498_v47  ;;  %v2771_v32 = vpop.f32.mrb[59].mxu1  ;;  %v1708_v24 = vld [vmem:[%s4527_s5 + $0x258] sm:$0xff] }
 0x2d1   : > { %v1725_v32 = vld [vmem:[%s4527_s5 + $0x2e0] sm:$0xff] }
 0x2d2   : > { %v1627_v18 = vmax.f32 %v1598_v17, 0.0 }
 0x2d3   : > { %v1602_v59 = vpop.f32.mrb[60].mxu1 }
 0x2d4   : > { %v1603_v23 = vadd.f32 %v1602_v59, %v1503_v0  ;;  %v2774_v62 = vpop.f32.mrb[61].mxu1  ;;  %1816 = vmatprep.mubr.f32.mxu0 %v1627_v18  ;;  %v3056_v0 = vpack.c.bf16 %v1704_v52, %v1703_v29  ;;  %v1737_v59 = vld [vmem:[%s4527_s5 + $0x340] sm:$0xff] }
 0x2d5   : > { %1817 = vmatmul.mubr.f32.vlgmr.msra.gmra.mrb[90].mxu0 %v1626_v6  ;;  %v1710_v6 = vld [vmem:[%s4527_s5 + $0x268] sm:$0xff] }
 0x2d6   : > { %3045 = vmatpush3.bf16.msra.mxu0 %v3044_v31  ;;  %v1628_v39 = vmax.f32 %v1603_v23, 0.0  ;;  %v1709_v31 = vld [vmem:[%s4527_s5 + $0x260] sm:$0xff] }
 0x2d7   : > { %v1607_v7 = vpop.f32.mrb[62].mxu1  ;;  %3047 = vmatprep.subr.bf16.mxu0 %v3046_v61  ;;  %v1738_v61 = vld [vmem:[%s4527_s5 + $0x348] sm:$0xff]  ;;  %v3068_v23 = vpack.c.bf16 %v1710_v6, %v1709_v31 }
 0x2d8   : > { %v1608_v8 = vadd.f32 %v1607_v7, %v1508_v27  ;;  %v2777_v51 = vpop.f32.mrb[63].mxu1  ;;  %v3058_v27 = vpack.c.bf16 %v1722_v46, %v1721_v34  ;;  %v3087_v62 = vpack.c.bf16 %v1738_v61, %v1737_v59  ;;  %v1740_v7 = vld [vmem:[%s4527_s5 + $0x358] sm:$0xff] }
 0x2d9   : > { %v3090_v3 = vpack.c.bf16 %v1740_v7, %v1739_v60 }
 0x2da   : > { %v1629_v22 = vmax.f32 %v1608_v8, 0.0  ;;  %3049 = vmatpush3.bf16.msra.mxu0 %v3048_v5  ;;  %v1712_v5 = vld [vmem:[%s4527_s5 + $0x278] sm:$0xff]  ;;  %v3093_v8 = vpack.c.bf16 %v1742_v54, %v1741_v45 }
 0x2db   : > { %v1612_v33 = vpop.f32.mrb[64].mxu1  ;;  %3051 = vmatprep.subr.bf16.mxu0 %v3050_v9  ;;  %v3072_v9 = vpack.c.bf16 %v1712_v5, %v1711_v49 }
 0x2dc   : > { %v4405_v47 = vadd.f32 %v1612_v33, %v1513_v41  ;;  %v2780_v30 = vpop.f32.mrb[65].mxu1  ;;  %1886 = vmatprep.mubr.f32.mxu1 %v1629_v22  ;;  %v3096_v22 = vpack.c.bf16 %v1744_v14, %v1743_v38  ;;  %v2188_v33 = vld [vmem:[%s4528_s6] ss:$0 sm:$0xff] }
 0x2dd   : > { %1887 = vmatmul.mubr.f32.vlgmr.msra.gmra.mrb[70].mxu1 %v1628_v39 }
 0x2de   : > { %3053 = vmatpush3.bf16.msra.mxu0 %v3052_v57  ;;  %3076 = vmatpush3.bf16.msra.mxu1 %v3075_v15  ;;  %v1630_v51 = vmax.f32 %v4405_v47, 0.0 }
 0x2df   : > { %v1617_v58 = vpop.f32.mrb[66].mxu1  ;;  %3055 = vmatprep.subr.bf16.mxu0 %v3054_v48  ;;  %3077 = vmatprep.subr.bf16.mxu1 %v3151_v2 }
 0x2e0   : > { %v1618_v41 = vadd.f32 %v1617_v58, %v4347_v42  ;;  %v2783_v53 = vpop.f32.mrb[67].mxu1  ;;  %2819 = vmatprep.mubr.msk.f32.mxu1 %vm3153_vm3, %v3154_v4  ;;  %v1707_v42 = vld [vmem:[%s4527_s5 + $0x250] sm:$0xff]  ;;  %v2033_v58 = vld [vmem:[%s4529_s7] sm:$0xff] }
 0x2e1   : > { %v1735_v4 = vld [vmem:[%s4527_s5 + $0x330] sm:$0xff]  ;;  %v3064_v50 = vpack.c.bf16 %v1708_v24, %v1707_v42 }
 0x2e2   : > { %v1631_v40 = vmax.f32 %v1618_v41, 0.0  ;;  %3057 = vmatpush3.bf16.msra.mxu0 %v3056_v0  ;;  %3079 = vmatpush3.bf16.msra.mxu1 %v3078_v25  ;;  %v3084_v18 = vpack.c.bf16 %v1736_v16, %v1735_v4 }
 0x2e3   : > { %v1622_v21 = vpop.f32.mrb[68].mxu1  ;;  %3059 = vmatprep.subr.bf16.mxu0 %v3058_v27  ;;  %3080 = vmatprep.subr.bf16.mxu1 %v3151_v2 }
 0x2e4   : > { %v1623_v28 = vadd.f32 %v1622_v21, %v4349_v26  ;;  %v2786_v17 = vpop.f32.mrb[69].mxu1  ;;  %1956 = vmatprep.mubr.f32.mxu0 %v1631_v40  ;;  %v3066_v26 = vpack.c.bf16 %v1726_v12, %v1725_v32 }
 0x2e6   : > { %3061 = vmatpush3.bf16.msra.mxu0 %v3060_v63  ;;  %3082 = vmatpush3.bf16.msra.mxu1 %v3081_v36  ;;  %v1632_v57 = vmax.f32 %v1623_v28, 0.0 }
 0x2e7   : > { %3063 = vmatprep.subr.bf16.mxu0 %v3062_v10  ;;  %3083 = vmatprep.subr.bf16.mxu1 %v3151_v2 }
 0x2ea   : > { %3065 = vmatpush3.bf16.msra.mxu0 %v3064_v50  ;;  %3085 = vmatpush3.bf16.msra.mxu1 %v3084_v18 }
 0x2eb   : > { %3067 = vmatprep.subr.bf16.mxu0 %v3066_v26  ;;  %3086 = vmatprep.subr.bf16.mxu1 %v3151_v2 }
 0x2ee   : > { %3069 = vmatpush3.bf16.msra.mxu0 %v3068_v23  ;;  %3088 = vmatpush3.bf16.msra.mxu1 %v3087_v62 }
 0x2ef   : > { %3071 = vmatprep.subr.bf16.mxu0 %v3070_v56  ;;  %3089 = vmatprep.subr.bf16.mxu1 %v3151_v2 }
 0x2f2   : > { %3073 = vmatpush3.bf16.msra.mxu0 %v3072_v9  ;;  %3091 = vmatpush3.bf16.msra.mxu1 %v3090_v3 }
 0x2f3   : > { %3092 = vmatprep.subr.bf16.mxu1 %v3151_v2 }
 0x2f5   : > { %1957 = vmatmul.mubr.f32.vlgmr.msra.gmra.mrb[92].mxu0 %v1630_v51 }
 0x2f6   : > { %3094 = vmatpush3.bf16.msra.mxu1 %v3093_v8 }
 0x2f7   : > { %3095 = vmatprep.subr.bf16.mxu1 %v3151_v2 }
 0x2fa   : > { %3097 = vmatpush3.bf16.msra.mxu1 %v3096_v22 }
 0x2fd   : > { %2820 = vmatmul.mubr.f32.vlgmr.msra.gmra.mrb[72].mxu1 %v1632_v57 }
 0x3a8   : > { %v2505_v15 = vpop.f32.mrb[90].mxu0 }
 0x3a9   : > { %v2506_v29 = vpop.f32.mrb[91].mxu0 }
 0x3aa   : > { %v2507_v39 = vadd.f32 %v2506_v29, %v2505_v15 }
 0x3ac   : > { %v1819_v20 = vadd.f32 %v2507_v39, %v2188_v33 }
 0x3b0   : > { %v2540_v48 = vpop.f32.mrb[70].mxu1 }
 0x3b1   : > { %v2541_v52 = vpop.f32.mrb[71].mxu1 }
 0x3b2   : > { %v2542_v19 = vadd.f32 %v2541_v52, %v2540_v48 }
 0x3b4   : > { %v1889_v47 = vadd.f32 %v2542_v19, %v1819_v20 }
 0x3c8   : > { %v2575_v30 = vpop.f32.mrb[92].mxu0 }
 0x3c9   : > { %v2576_v34 = vpop.f32.mrb[93].mxu0 }
 0x3ca   : > { %v2577_v46 = vadd.f32 %v2576_v34, %v2575_v30 }
 0x3cc   : > { %v1959_v2 = vadd.f32 %v2577_v46, %v1889_v47 }
 0x3d0   : > { %v2028_v0 = vpop.f32.mrb[72].mxu1 }
 0x3d1   : > { %v2029_v25 = vadd.f32 %v2028_v0, %v1959_v2  ;;  %v2821_v11 = vpop.f32.mrb[73].mxu1 }
 0x3d3   : > { %v2032_v27 = vmul.f32 11.313708, %v2029_v25 }
 0x3d5   : > { %v2034_v35 = vadd.f32 %v2033_v58, %v2032_v27 }
 0x3d7   : > { %2035 = vst [vmem:[%s354_s21] sm:$0xff] %v2034_v35 }
 0x3d8 PF: > { %s18_s29 = sadd.s32 1, %s3149_s29   ;;  %s4531_s27 = smov %s3145_s28 }
 0x3d9   : > { %p15_p5 = scmp.ge.s32.totalorder %s18_s29, 4   ;;  %s4532_s28 = smov %s4534_s30 }
 0x3db   :  { %17 = sbr.rel (!%p15_p5) target bundleno = 2 (0x2), region = 85 }

</bundles_post_ra>
